<compile_context>
chip_gen: v7x
topology: tpu7x:2x2x1
jax: 0.10.0
libtpu: 0.0.40
codegen_flags: <defaults>
</compile_context>

<pallas_src>
import jax
import jax.numpy as jnp
from jax.experimental import pallas as pl
from jax.experimental.pallas import tpu as pltpu

LANE = 128      # f32/bf16 lane width
SUBLANE = 8     # f32 sublane height


def _round_up(n, m):
    return ((n + m - 1) // m) * m


def _pad_to(a, shape):
    pads = [(0, t - s) for s, t in zip(a.shape, shape)]
    return jnp.pad(a, pads)


def vae_forward_kernel(
    x_ref,        # (TB, Dp)   bf16 input tile
    w1_ref,       # (Dp, Hp)   bf16 encoder linear 1 weight (in x out layout)
    b1_ref,       # (1, Hp)    f32
    w2_ref,       # (Hp, 2Zp)  bf16 encoder linear 2 weight (mu | log_var packed)
    b2_ref,       # (1, 2Zp)   f32
    eps_ref,      # (TB, Zp)   f32 standard-normal noise
    w3_ref,       # (Zp, Hp)   bf16 decoder linear 1 weight
    b3_ref,       # (1, Hp)    f32
    w4_ref,       # (Hp, Dp)   bf16 decoder linear 2 weight
    b4_ref,       # (1, Dp)    f32
    out_ref,      # (TB, Dp)   f32 decoded output tile
    enc_ref,      # (TB, 2Zp)  f32 packed [mu | log_var] tile (lane-dense store)
):
    zp = eps_ref.shape[1]  # padded latent dim (multiple of 128)

    # ---- encoder ----
    h = jnp.dot(x_ref[...], w1_ref[...],
                preferred_element_type=jnp.float32) + b1_ref[...]
    h = jnp.where(h > 0, h, 0.2 * h)                      # LeakyReLU(0.2)
    enc = jnp.dot(h.astype(jnp.bfloat16), w2_ref[...],
                  preferred_element_type=jnp.float32) + b2_ref[...]
    enc_ref[...] = enc.astype(enc_ref.dtype)              # single lane-dense store

    mu = enc[:, :zp]        # lane-aligned slice (offset 0)
    log_var = enc[:, zp:]   # lane-aligned slice (offset multiple of 128)

    # ---- reparametrize: z = mu + eps * exp(log_var / 2) ----
    # padded latent lanes: mu=log_var=0, eps=0  =>  z=0 there (decoder rows also 0)
    z = mu + eps_ref[...] * jnp.exp(log_var * 0.5)

    # ---- decoder ----
    hd = jnp.dot(z.astype(jnp.bfloat16), w3_ref[...],
                 preferred_element_type=jnp.float32) + b3_ref[...]
    hd = jnp.maximum(hd, 0.0)                             # ReLU
    logits = jnp.dot(hd.astype(jnp.bfloat16), w4_ref[...],
                     preferred_element_type=jnp.float32) + b4_ref[...]
    out_ref[...] = jax.nn.sigmoid(logits).astype(out_ref.dtype)


def vae_forward(x, params, eps, *, block_b=128):
    """Run the VAE forward pass with one batch-tiled Pallas call.

    x:      (B, image_size) float32
    params: dict with w1 (D,H), b1 (1,H), w2 (H,2Z), b2 (1,2Z),
                      w3 (Z,H), b3 (1,H), w4 (H,D), b4 (1,D)   (in x out layout)
    eps:    (B, z_dim) float32
    Returns (output (B,D), mu (B,Z), log_var (B,Z)), all float32.
    """
    B, D = x.shape
    Z = eps.shape[1]
    H = params["w1"].shape[1]

    Dp = _round_up(D, LANE)
    Hp = _round_up(H, LANE)
    Zp = _round_up(Z, LANE)
    TB = min(_round_up(block_b, SUBLANE), _round_up(B, SUBLANE))
    Bp = _round_up(B, TB)

    # ---- pad + lay out operands (matmul operands in bf16, f32 accumulate) ----
    x_p = _pad_to(x.astype(jnp.float32), (Bp, Dp)).astype(jnp.bfloat16)
    eps_p = _pad_to(eps.astype(jnp.float32), (Bp, Zp))

    w1 = _pad_to(params["w1"], (Dp, Hp)).astype(jnp.bfloat16)
    b1 = _pad_to(params["b1"], (1, Hp)).astype(jnp.float32)

    # pack mu / log_var columns into lane-aligned halves of width Zp each
    w2_p = jnp.zeros((Hp, 2 * Zp), jnp.float32)
    w2_p = w2_p.at[:H, :Z].set(params["w2"][:, :Z])
    w2_p = w2_p.at[:H, Zp:Zp + Z].set(params["w2"][:, Z:])
    w2_p = w2_p.astype(jnp.bfloat16)
    b2_p = jnp.zeros((1, 2 * Zp), jnp.float32)
    b2_p = b2_p.at[:, :Z].set(params["b2"][:, :Z])
    b2_p = b2_p.at[:, Zp:Zp + Z].set(params["b2"][:, Z:])

    w3 = _pad_to(params["w3"], (Zp, Hp)).astype(jnp.bfloat16)
    b3 = _pad_to(params["b3"], (1, Hp)).astype(jnp.float32)
    w4 = _pad_to(params["w4"], (Hp, Dp)).astype(jnp.bfloat16)
    b4 = _pad_to(params["b4"], (1, Dp)).astype(jnp.float32)

    grid = (Bp // TB,)
    batch_map = lambda i: (i, 0)
    const_map = lambda i: (0, 0)   # weights: same block every step -> stay resident

    in_specs = [
        pl.BlockSpec((TB, Dp), batch_map),        # x
        pl.BlockSpec((Dp, Hp), const_map),        # w1
        pl.BlockSpec((1, Hp), const_map),         # b1
        pl.BlockSpec((Hp, 2 * Zp), const_map),    # w2 (packed)
        pl.BlockSpec((1, 2 * Zp), const_map),     # b2 (packed)
        pl.BlockSpec((TB, Zp), batch_map),        # eps
        pl.BlockSpec((Zp, Hp), const_map),        # w3
        pl.BlockSpec((1, Hp), const_map),         # b3
        pl.BlockSpec((Hp, Dp), const_map),        # w4
        pl.BlockSpec((1, Dp), const_map),         # b4
    ]
    out_specs = (
        pl.BlockSpec((TB, Dp), batch_map),        # decoded output
        pl.BlockSpec((TB, 2 * Zp), batch_map),    # packed [mu | log_var]
    )
    out_shapes = (
        jax.ShapeDtypeStruct((Bp, Dp), jnp.float32),
        jax.ShapeDtypeStruct((Bp, 2 * Zp), jnp.float32),
    )

    # advisory cost estimate so XLA schedules surrounding ops around this call
    flops = 2 * Bp * (Dp * Hp + Hp * 2 * Zp + Zp * Hp + Hp * Dp)
    transcendentals = Bp * (Zp + Dp)
    bytes_accessed = (
        Bp * Dp * 2 + Bp * Zp * 4                                  # x (bf16), eps (f32)
        + 2 * (Dp * Hp + Hp * 2 * Zp + Zp * Hp + Hp * Dp)          # bf16 weights
        + 4 * (Hp + 2 * Zp + Hp + Dp)                              # f32 biases
        + Bp * Dp * 4 + Bp * 2 * Zp * 4                            # outputs
    )

    out_p, enc_p = pl.pallas_call(
        vae_forward_kernel,
        out_shape=out_shapes,
        grid=grid,
        in_specs=in_specs,
        out_specs=out_specs,
        compiler_params=pltpu.CompilerParams(
            dimension_semantics=("parallel",),   # batch tiles shard across TCs (v7x)
        ),
        cost_estimate=pl.CostEstimate(
            flops=flops,
            transcendentals=transcendentals,
            bytes_accessed=bytes_accessed,
        ),
    )(x_p, w1, b1, w2_p, b2_p, eps_p, w3, b3, w4, b4)

    out = out_p[:B, :D]
    mu = enc_p[:B, :Z]
    log_var = enc_p[:B, Zp:Zp + Z]
    return out, mu, log_var


def init_params(key, image_size, h_dim, z_dim):
    """Deterministic PyTorch-style (uniform +/- 1/sqrt(fan_in)) initialization."""
    def linear(k, fan_in, fan_out):
        kw, kb = jax.random.split(k)
        bound = 1.0 / jnp.sqrt(fan_in)
        w = jax.random.uniform(kw, (fan_in, fan_out), jnp.float32, -bound, bound)
        b = jax.random.uniform(kb, (1, fan_out), jnp.float32, -bound, bound)
        return w, b

    k1, k2, k3, k4 = jax.random.split(key, 4)
    w1, b1 = linear(k1, image_size, h_dim)       # encoder[0]
    w2, b2 = linear(k2, h_dim, 2 * z_dim)        # encoder[2]
    w3, b3 = linear(k3, z_dim, h_dim)            # decoder[0]
    w4, b4 = linear(k4, h_dim, image_size)       # decoder[2]
    return dict(w1=w1, b1=b1, w2=w2, b2=b2, w3=w3, b3=b3, w4=w4, b4=b4)


def vae_forward_ref(x, params, eps):
    """Pure-JAX reference for correctness checking."""
    h = x @ params["w1"] + params["b1"]
    h = jnp.where(h > 0, h, 0.2 * h)
    enc = h @ params["w2"] + params["b2"]
    z_dim = eps.shape[1]
    mu, log_var = enc[:, :z_dim], enc[:, z_dim:]
    z = mu + eps * jnp.exp(log_var * 0.5)
    hd = jnp.maximum(z @ params["w3"] + params["b3"], 0.0)
    out = jax.nn.sigmoid(hd @ params["w4"] + params["b4"])
    return out, mu, log_var


if __name__ == "__main__":
    # Small shapes consistent with the module (image_size, h_dim, z_dim are ctor args).
    batch = 256          # 2 batch tiles of 128 rows -> exercises the grid / pipelining
    image_size = 256
    h_dim = 128
    z_dim = 8

    key = jax.random.PRNGKey(0)
    k_x, k_eps, k_params = jax.random.split(key, 3)

    x = jax.random.uniform(k_x, (batch, image_size), jnp.float32)  # "image" data in [0,1)
    eps = jax.random.normal(k_eps, (batch, z_dim), jnp.float32)    # torch.randn equivalent
    params = init_params(k_params, image_size, h_dim, z_dim)

    out, mu, log_var = vae_forward(x, params, eps, block_b=128)
    jax.block_until_ready((out, mu, log_var))

    # Sanity check against pure-JAX reference (loose tol: bf16 MXU matmul operands).
    out_r, mu_r, lv_r = vae_forward_ref(x, params, eps)
    assert out.shape == (batch, image_size)
    assert mu.shape == (batch, z_dim) and log_var.shape == (batch, z_dim)
    assert jnp.allclose(out, out_r, atol=5e-2, rtol=5e-2)
    assert jnp.allclose(mu, mu_r, atol=5e-2, rtol=5e-2)
    assert jnp.allclose(log_var, lv_r, atol=5e-2, rtol=5e-2)

    print("KERNEL_OK")
</pallas_src>

<mosaic_0001>
module attributes {stable_mosaic.version = 11 : i64} {
  func.func @vae_forward_kernel(%arg0: i32, %arg1: memref<128x256xbf16, #tpu.memory_space<vmem>>, %arg2: memref<256x128xbf16, #tpu.memory_space<vmem>>, %arg3: memref<1x128xf32, #tpu.memory_space<vmem>>, %arg4: memref<128x256xbf16, #tpu.memory_space<vmem>>, %arg5: memref<1x256xf32, #tpu.memory_space<vmem>>, %arg6: memref<128x128xf32, #tpu.memory_space<vmem>>, %arg7: memref<128x128xbf16, #tpu.memory_space<vmem>>, %arg8: memref<1x128xf32, #tpu.memory_space<vmem>>, %arg9: memref<128x256xbf16, #tpu.memory_space<vmem>>, %arg10: memref<1x256xf32, #tpu.memory_space<vmem>>, %arg11: memref<128x256xf32, #tpu.memory_space<vmem>>, %arg12: memref<128x256xf32, #tpu.memory_space<vmem>>) attributes {dimension_semantics = [#tpu.dimension_semantics<parallel>], iteration_bounds = array<i64: 2>, scalar_prefetch = 0 : i64, scratch_operands = 0 : i64, tpu.core_type = #tpu.core_type<tc>, window_params = [{transform_indices = @transform_0, window_bounds = array<i64: 128, 256>}, {pipeline_mode = #tpu.pipeline_mode<synchronous>, transform_indices = @transform_1, window_bounds = array<i64: 256, 128>}, {pipeline_mode = #tpu.pipeline_mode<synchronous>, transform_indices = @transform_2, window_bounds = array<i64: 1, 128>}, {pipeline_mode = #tpu.pipeline_mode<synchronous>, transform_indices = @transform_3, window_bounds = array<i64: 128, 256>}, {pipeline_mode = #tpu.pipeline_mode<synchronous>, transform_indices = @transform_4, window_bounds = array<i64: 1, 256>}, {transform_indices = @transform_5, window_bounds = array<i64: 128, 128>}, {pipeline_mode = #tpu.pipeline_mode<synchronous>, transform_indices = @transform_6, window_bounds = array<i64: 128, 128>}, {pipeline_mode = #tpu.pipeline_mode<synchronous>, transform_indices = @transform_7, window_bounds = array<i64: 1, 128>}, {pipeline_mode = #tpu.pipeline_mode<synchronous>, transform_indices = @transform_8, window_bounds = array<i64: 128, 256>}, {pipeline_mode = #tpu.pipeline_mode<synchronous>, transform_indices = @transform_9, window_bounds = array<i64: 1, 256>}, {transform_indices = @transform_10, window_bounds = array<i64: 128, 256>}, {transform_indices = @transform_11, window_bounds = array<i64: 128, 256>}]} {
    %c0 = arith.constant 0 : index
    %c0_0 = arith.constant 0 : index
    %0 = vector.load %arg1[%c0, %c0_0] : memref<128x256xbf16, #tpu.memory_space<vmem>>, vector<128x256xbf16>
    %c0_1 = arith.constant 0 : index
    %c0_2 = arith.constant 0 : index
    %1 = vector.load %arg2[%c0_1, %c0_2] : memref<256x128xbf16, #tpu.memory_space<vmem>>, vector<256x128xbf16>
    %cst = arith.constant dense<0.000000e+00> : vector<128x128xf32>
    %2 = tpu.matmul %0, %1, %cst {dimension_numbers = #tpu.dot_dimension_numbers<[1], [0], [0], [1], [0, 0, 1, 1], [], []>} : vector<128x256xbf16>, vector<256x128xbf16>, vector<128x128xf32> -> vector<128x128xf32>
    %c0_3 = arith.constant 0 : index
    %c0_4 = arith.constant 0 : index
    %3 = vector.load %arg3[%c0_3, %c0_4] : memref<1x128xf32, #tpu.memory_space<vmem>>, vector<1x128xf32>
    %4 = vector.broadcast %3 : vector<1x128xf32> to vector<128x128xf32>
    %5 = arith.addf %2, %4 : vector<128x128xf32>
    %cst_5 = arith.constant 0.000000e+00 : f32
    %6 = vector.broadcast %cst_5 : f32 to vector<128x128xf32>
    %7 = arith.cmpf ogt, %5, %6 : vector<128x128xf32>
    %cst_6 = arith.constant 2.000000e-01 : f32
    %8 = vector.broadcast %cst_6 : f32 to vector<128x128xf32>
    %9 = arith.mulf %8, %5 : vector<128x128xf32>
    %10 = arith.select %7, %5, %9 : vector<128x128xi1>, vector<128x128xf32>
    %11 = arith.truncf %10 : vector<128x128xf32> to vector<128x128xbf16>
    %c0_7 = arith.constant 0 : index
    %c0_8 = arith.constant 0 : index
    %12 = vector.load %arg4[%c0_7, %c0_8] : memref<128x256xbf16, #tpu.memory_space<vmem>>, vector<128x256xbf16>
    %cst_9 = arith.constant dense<0.000000e+00> : vector<128x256xf32>
    %13 = tpu.matmul %11, %12, %cst_9 {dimension_numbers = #tpu.dot_dimension_numbers<[1], [0], [0], [1], [0, 0, 1, 1], [], []>} : vector<128x128xbf16>, vector<128x256xbf16>, vector<128x256xf32> -> vector<128x256xf32>
    %c0_10 = arith.constant 0 : index
    %c0_11 = arith.constant 0 : index
    %14 = vector.load %arg5[%c0_10, %c0_11] : memref<1x256xf32, #tpu.memory_space<vmem>>, vector<1x256xf32>
    %15 = vector.broadcast %14 : vector<1x256xf32> to vector<128x256xf32>
    %16 = arith.addf %13, %15 : vector<128x256xf32>
    %c0_12 = arith.constant 0 : index
    %c0_13 = arith.constant 0 : index
    %17 = vector.load %arg12[%c0_12, %c0_13] : memref<128x256xf32, #tpu.memory_space<vmem>>, vector<128x256xf32>
    tpu.vector_store %arg12[%c0_12, %c0_13], %16 {strides = array<i32>} : memref<128x256xf32, #tpu.memory_space<vmem>>, vector<128x256xf32>,
    %18 = vector.extract_strided_slice %16 {offsets = [0, 0], sizes = [128, 128], strides = [1, 1]} : vector<128x256xf32> to vector<128x128xf32>
    %19 = vector.extract_strided_slice %16 {offsets = [0, 128], sizes = [128, 128], strides = [1, 1]} : vector<128x256xf32> to vector<128x128xf32>
    %c0_14 = arith.constant 0 : index
    %c0_15 = arith.constant 0 : index
    %20 = vector.load %arg6[%c0_14, %c0_15] : memref<128x128xf32, #tpu.memory_space<vmem>>, vector<128x128xf32>
    %cst_16 = arith.constant 5.000000e-01 : f32
    %21 = vector.broadcast %cst_16 : f32 to vector<128x128xf32>
    %22 = arith.mulf %19, %21 : vector<128x128xf32>
    %23 = math.exp %22 : vector<128x128xf32>
    %24 = arith.mulf %20, %23 : vector<128x128xf32>
    %25 = arith.addf %18, %24 : vector<128x128xf32>
    %26 = arith.truncf %25 : vector<128x128xf32> to vector<128x128xbf16>
    %c0_17 = arith.constant 0 : index
    %c0_18 = arith.constant 0 : index
    %27 = vector.load %arg7[%c0_17, %c0_18] : memref<128x128xbf16, #tpu.memory_space<vmem>>, vector<128x128xbf16>
    %cst_19 = arith.constant dense<0.000000e+00> : vector<128x128xf32>
    %28 = tpu.matmul %26, %27, %cst_19 {dimension_numbers = #tpu.dot_dimension_numbers<[1], [0], [0], [1], [0, 0, 1, 1], [], []>} : vector<128x128xbf16>, vector<128x128xbf16>, vector<128x128xf32> -> vector<128x128xf32>
    %c0_20 = arith.constant 0 : index
    %c0_21 = arith.constant 0 : index
    %29 = vector.load %arg8[%c0_20, %c0_21] : memref<1x128xf32, #tpu.memory_space<vmem>>, vector<1x128xf32>
    %30 = vector.broadcast %29 : vector<1x128xf32> to vector<128x128xf32>
    %31 = arith.addf %28, %30 : vector<128x128xf32>
    %cst_22 = arith.constant 0.000000e+00 : f32
    %32 = vector.broadcast %cst_22 : f32 to vector<128x128xf32>
    %33 = arith.maximumf %31, %32 : vector<128x128xf32>
    %34 = arith.truncf %33 : vector<128x128xf32> to vector<128x128xbf16>
    %c0_23 = arith.constant 0 : index
    %c0_24 = arith.constant 0 : index
    %35 = vector.load %arg9[%c0_23, %c0_24] : memref<128x256xbf16, #tpu.memory_space<vmem>>, vector<128x256xbf16>
    %cst_25 = arith.constant dense<0.000000e+00> : vector<128x256xf32>
    %36 = tpu.matmul %34, %35, %cst_25 {dimension_numbers = #tpu.dot_dimension_numbers<[1], [0], [0], [1], [0, 0, 1, 1], [], []>} : vector<128x128xbf16>, vector<128x256xbf16>, vector<128x256xf32> -> vector<128x256xf32>
    %c0_26 = arith.constant 0 : index
    %c0_27 = arith.constant 0 : index
    %37 = vector.load %arg10[%c0_26, %c0_27] : memref<1x256xf32, #tpu.memory_space<vmem>>, vector<1x256xf32>
    %38 = vector.broadcast %37 : vector<1x256xf32> to vector<128x256xf32>
    %39 = arith.addf %36, %38 : vector<128x256xf32>
    %40 = arith.negf %39 : vector<128x256xf32>
    %41 = math.exp %40 : vector<128x256xf32>
    %cst_28 = arith.constant 1.000000e+00 : f32
    %42 = vector.broadcast %cst_28 : f32 to vector<128x256xf32>
    %43 = arith.addf %42, %41 : vector<128x256xf32>
    %44 = arith.divf %42, %43 : vector<128x256xf32>
    %c0_29 = arith.constant 0 : index
    %c0_30 = arith.constant 0 : index
    %45 = vector.load %arg11[%c0_29, %c0_30] : memref<128x256xf32, #tpu.memory_space<vmem>>, vector<128x256xf32>
    tpu.vector_store %arg11[%c0_29, %c0_30], %44 {strides = array<i32>} : memref<128x256xf32, #tpu.memory_space<vmem>>, vector<128x256xf32>,
    return
  }
  func.func @transform_0(%arg0: i32) -> (i32, i32) {
    %c0_i32 = arith.constant 0 : i32
    %c0_i32_0 = arith.constant 0 : i32
    return %arg0, %c0_i32 : i32, i32
  }
  func.func @transform_1(%arg0: i32) -> (i32, i32) {
    %c0_i32 = arith.constant 0 : i32
    %c0_i32_0 = arith.constant 0 : i32
    %c0_i32_1 = arith.constant 0 : i32
    return %c0_i32, %c0_i32_0 : i32, i32
  }
  func.func @transform_2(%arg0: i32) -> (i32, i32) {
    %c0_i32 = arith.constant 0 : i32
    %c0_i32_0 = arith.constant 0 : i32
    %c0_i32_1 = arith.constant 0 : i32
    return %c0_i32, %c0_i32_0 : i32, i32
  }
  func.func @transform_3(%arg0: i32) -> (i32, i32) {
    %c0_i32 = arith.constant 0 : i32
    %c0_i32_0 = arith.constant 0 : i32
    %c0_i32_1 = arith.constant 0 : i32
    return %c0_i32, %c0_i32_0 : i32, i32
  }
  func.func @transform_4(%arg0: i32) -> (i32, i32) {
    %c0_i32 = arith.constant 0 : i32
    %c0_i32_0 = arith.constant 0 : i32
    %c0_i32_1 = arith.constant 0 : i32
    return %c0_i32, %c0_i32_0 : i32, i32
  }
  func.func @transform_5(%arg0: i32) -> (i32, i32) {
    %c0_i32 = arith.constant 0 : i32
    %c0_i32_0 = arith.constant 0 : i32
    return %arg0, %c0_i32 : i32, i32
  }
  func.func @transform_6(%arg0: i32) -> (i32, i32) {
    %c0_i32 = arith.constant 0 : i32
    %c0_i32_0 = arith.constant 0 : i32
    %c0_i32_1 = arith.constant 0 : i32
    return %c0_i32, %c0_i32_0 : i32, i32
  }
  func.func @transform_7(%arg0: i32) -> (i32, i32) {
    %c0_i32 = arith.constant 0 : i32
    %c0_i32_0 = arith.constant 0 : i32
    %c0_i32_1 = arith.constant 0 : i32
    return %c0_i32, %c0_i32_0 : i32, i32
  }
  func.func @transform_8(%arg0: i32) -> (i32, i32) {
    %c0_i32 = arith.constant 0 : i32
    %c0_i32_0 = arith.constant 0 : i32
    %c0_i32_1 = arith.constant 0 : i32
    return %c0_i32, %c0_i32_0 : i32, i32
  }
  func.func @transform_9(%arg0: i32) -> (i32, i32) {
    %c0_i32 = arith.constant 0 : i32
    %c0_i32_0 = arith.constant 0 : i32
    %c0_i32_1 = arith.constant 0 : i32
    return %c0_i32, %c0_i32_0 : i32, i32
  }
  func.func @transform_10(%arg0: i32) -> (i32, i32) {
    %c0_i32 = arith.constant 0 : i32
    %c0_i32_0 = arith.constant 0 : i32
    return %arg0, %c0_i32 : i32, i32
  }
  func.func @transform_11(%arg0: i32) -> (i32, i32) {
    %c0_i32 = arith.constant 0 : i32
    %c0_i32_0 = arith.constant 0 : i32
    return %arg0, %c0_i32 : i32, i32
  }
}

</mosaic_0001>

<bundles_post_ra>
// kernel: tpu_custom_call.1
= control target key start
LH: loop header
LB: loop body
LE: loop exit
PB: predicated region body
PF: predicated region fallthrough
CT: control target
= control target key end

     0   :  { %s3799_s0 = inlined_call_operand.hbm [shape: bf16[256,256], index: 0, kind: input, shape index: {}]   ;;  %s3800_s1 = inlined_call_operand.hbm [shape: bf16[256,128], index: 1, kind: input, shape index: {}]   ;;  %s3801_s2 = inlined_call_operand.vmem [shape: f32[1,128], index: 2, kind: input, shape index: {}]   ;;  %s3802_s3 = inlined_call_operand.hbm [shape: bf16[128,256], index: 3, kind: input, shape index: {}]   ;;  %s3803_s4 = inlined_call_operand.vmem [shape: f32[1,256], index: 4, kind: input, shape index: {}]   ;;  %s3804_s5 = inlined_call_operand.hbm [shape: f32[256,128], index: 5, kind: input, shape index: {}]   ;;  %s3805_s6 = inlined_call_operand.hbm [shape: bf16[128,128], index: 6, kind: input, shape index: {}]   ;;  %s3806_s7 = inlined_call_operand.vmem [shape: f32[1,128], index: 7, kind: input, shape index: {}]   ;;  %s3807_s8 = inlined_call_operand.hbm [shape: bf16[128,256], index: 8, kind: input, shape index: {}]   ;;  %s3808_s9 = inlined_call_operand.vmem [shape: f32[1,256], index: 9, kind: input, shape index: {}]   ;;  %s3809_s10 = inlined_call_operand.hbm [shape: f32[256,256], index: 10, kind: output, shape index: {0}]   ;;  %s3810_s11 = inlined_call_operand.hbm [shape: f32[256,256], index: 11, kind: output, shape index: {1}]  }
   0x1   :  { %3822 = sst [smem:[#allocation25_spill]] %s3799_s0 }
   0x2   :  { %3823 = sst [smem:[#allocation26_spill]] %s3800_s1 }
   0x3   :  { %3824 = sst [smem:[#allocation27_spill]] %s3802_s3 }
   0x4   :  { %3825 = sst [smem:[#allocation28_spill]] %s3808_s9 }
   0x5   :  { %3826 = sst [smem:[#allocation29_spill]] %s3809_s10 }
   0x6   :  { %3827 = sst [smem:[#allocation30_spill]] %s3810_s11 }
   0x7   :  { %17 = vsyncpa [#allocation3], 0 }
   0x8   :  { %19 = vsyncpa [#allocation3 + $0x1], 0 }
   0x9   :  { %20 = vsyncpa [#allocation6], 0 }
   0xa   :  { %21 = vsyncpa [#allocation9], 0 }
   0xb   :  { %23 = vsyncpa [#allocation9 + $0x1], 0 }
   0xc   :  { %24 = vsyncpa [#allocation12], 0 }
   0xd   :  { %25 = vsyncpa [#allocation4], 0 }
   0xe   :  { %27 = vsyncpa [#allocation4 + $0x1], 0 }
   0xf   :  { %28 = vsyncpa [#allocation15], 0 }
  0x10   :  { %30 = vsyncpa [#allocation15 + $0x1], 0  ;;  %s3098_s17 = smov 0   ;;  %s3100_s18 = smov 0  }
  0x11   :  { %s3102_s19 = smov 0   ;;  %s3104_s20 = smov 0  }
  0x12 LB: > { %3828 = sst [smem:[#allocation23_spill]] %s3009_s17  ;;  %s3119_s21 = sadd.s32 4294967295, %s3021_s20   ;;  %s3021_s20 = sphi %s3104_s20, %s3861_s20   ;;  %s3017_s19 = sphi %s3102_s19, %s3860_s19   ;;  %s3013_s18 = sphi %s3100_s18, %s3859_s18   ;;  %s3009_s17 = sphi %s3098_s17, %s3858_s17  }
  0x13   : > { %s2101_s22 = sadd.s32 4294967294, %s3021_s20   ;;  %p56_p0 = scmp.ne.s32.totalorder %s3013_s18, %s3009_s17 }
  0x14   : > { %p3812_p1 = scmp.eq.s32.totalorder %s3119_s21, 0  ;;  %p280_p3 = scmp.eq.s32.totalorder %s2101_s22, 1 }
  0x15   : > { %p2102_p5 = scmp.ge.s32.totalorder %s3021_s20, 1  ;;  %p313_p7 = scmp.lt.s32.totalorder %s3021_s20, 3 }
  0x16   : > { %p3128_p4 = por %p3812_p1, %p56_p0  ;;  %p3133_p6 = por %p280_p3, %p56_p0 }
  0x17   : > { %p3138_p8 = pnand %p2102_p5, %p313_p7  ;;  %s3023_s26 = smov [#allocation5]  }
  0x18   : > { %s3829_s23 = scalar_select %p3128_p4, 1, 0 }
  0x19   : > { %s3830_s24 = scalar_select %p3133_p6, 1, 0 }
  0x1a   : > { %s3832_s25 = scalar_select %p3138_p8, 1, 0 }
  0x1b   : > { %3831 = sst [smem:[#allocation24_spill]] %s3830_s24  ;;  %s325_s27 = sshll.u32 %s3023_s26, 4  ;;  %s3142_s27 = int_to_ptr.vmem [resolvable:$true] %s325_s27 }
  0x1c   : > { %p2399_p9 = pneg %p3138_p8  ;;  %s3024_s29 = smov [#allocation10]  }
  0x1d   : > { %s357_s30 = sshll.u32 %s3024_s29, 4  ;;  %s3025_s12 = smov [#allocation7]   ;;  %s3153_s30 = int_to_ptr.vmem [resolvable:$true] %s357_s30 }
  0x1e   : > { %p3149_p11 = pnand %p2399_p9, %p3812_p1  ;;  %s3155_s13 = sshll.u32 %s3025_s12, 4  ;;  %s342_s13 = int_to_ptr.vmem [resolvable:$true] %s3155_s13 }
  0x1f   : > { %s3834_s1 = sld [smem:[#allocation26_spill]] }
  0x20   : > { %p3165_p13 = pneg %p3149_p11 }
  0x25   : > { %s2735_s16 = scalar_lea.hbm %s3834_s1, 2048 }
  0x26   : > { %p2736_p12 = scmp.ne.s32.totalorder %s3834_s1, %s2735_s16  ;;  %p2742_p5 = scmp.lt.u32.totalorder %s2735_s16, %s3834_s1 }
  0x28   : > { %p2738_p0 = pnand %p3165_p13, %p2736_p12 }
  0x2a   : > { %p2739_p3 = pneg %p2738_p0 }
  0x2c   : > { %p2744_p7 = pnand %p2742_p5, %p2739_p3 }
  0x2e   : > { %2747 = shalt.err (!%p2744_p7)
}
  0x2f   : > { %s2748_s14 = scalar_lea.vmem %s3142_s27, 2048  ;;  %p2756_p2 = scmp.lt.s32.totalorder %s3142_s27, %s3142_s27 }
  0x30   : > { %p2749_p9 = scmp.ne.s32.totalorder %s3142_s27, %s2748_s14  ;;  %p2757_p6 = scmp.lt.s32.totalorder %s2748_s14, %s2748_s14 }
  0x32   : > { %p2751_p10 = pnand %p2749_p9, %p3165_p13  ;;  %p2758_p12 = por %p2757_p6, %p2756_p2 }
  0x34   : > { %p2752_p1 = pneg %p2751_p10 }
  0x36   : > { %p2759_p0 = pnand %p2758_p12, %p2752_p1 }
  0x38   : > { %2762 = shalt.err (!%p2759_p0)
}
  0x39   : > { %s3026_s15 = smov 64   ;;  %s3027_s16 = smov 4  }
  0x3a   : > { %2402 = dma.hbm_to_vmem [thread:$0]  (!%p3149_p11), %s3834_s1, 2048, %s3142_s27, [#allocation6], %s3026_s15, %s3026_s15, %s3027_s16  }
  0x3b   : > { %s2763_s17 = scalar_lea.hbm %s3805_s6, 1024 }
  0x3c   : > { %p2764_p2 = scmp.ne.s32.totalorder %s3805_s6, %s2763_s17  ;;  %p2770_p10 = scmp.lt.u32.totalorder %s2763_s17, %s3805_s6 }
  0x3e   : > { %p2766_p1 = pnand %p2764_p2, %p3165_p13 }
  0x40   : > { %p2767_p6 = pneg %p2766_p1 }
  0x42   : > { %p2772_p3 = pnand %p2770_p10, %p2767_p6 }
  0x44   : > { %2775 = shalt.err (!%p2772_p3)
}
  0x45   : > { %s2776_s27 = scalar_lea.vmem %s3153_s30, 1024  ;;  %p2784_p12 = scmp.lt.s32.totalorder %s3153_s30, %s3153_s30 }
  0x46   : > { %p2777_p5 = scmp.ne.s32.totalorder %s3153_s30, %s2776_s27  ;;  %p2785_p0 = scmp.lt.s32.totalorder %s2776_s27, %s2776_s27 }
  0x48   : > { %p2779_p7 = pnand %p2777_p5, %p3165_p13  ;;  %p2786_p2 = por %p2785_p0, %p2784_p12 }
  0x4a   : > { %p2780_p9 = pneg %p2779_p7 }
  0x4c   : > { %p2787_p1 = pnand %p2786_p2, %p2780_p9 }
  0x4e   : > { %2790 = shalt.err (!%p2787_p1)
}
  0x4f   : > { %2408 = dma.hbm_to_vmem [thread:$0]  (!%p3149_p11), %s3805_s6, 1024, %s3153_s30, [#allocation9], %s3026_s15, %s3026_s15, %s3027_s16  }
  0x50   : > { %s3836_s3 = sld [smem:[#allocation27_spill]] }
  0x56   : > { %s2791_s22 = scalar_lea.hbm %s3836_s3, 2048 }
  0x57   : > { %p2792_p6 = scmp.ne.s32.totalorder %s3836_s3, %s2791_s22  ;;  %p2798_p5 = scmp.lt.u32.totalorder %s2791_s22, %s3836_s3 }
  0x59   : > { %p2794_p10 = pnand %p2792_p6, %p3165_p13 }
  0x5b   : > { %p2795_p3 = pneg %p2794_p10 }
  0x5d   : > { %p2800_p7 = pnand %p2798_p5, %p2795_p3 }
  0x5f   : > { %2803 = shalt.err (!%p2800_p7)
}
  0x60   : > { %s2804_s27 = scalar_lea.vmem %s342_s13, 2048  ;;  %p2812_p2 = scmp.lt.s32.totalorder %s342_s13, %s342_s13 }
  0x61   : > { %p2805_p9 = scmp.ne.s32.totalorder %s342_s13, %s2804_s27  ;;  %p2813_p1 = scmp.lt.s32.totalorder %s2804_s27, %s2804_s27 }
  0x63   : > { %p2807_p12 = pnand %p2805_p9, %p3165_p13  ;;  %p2814_p4 = por %p2813_p1, %p2812_p2 }
  0x65   : > { %p2808_p0 = pneg %p2807_p12 }
  0x67   : > { %p2815_p8 = pnand %p2814_p4, %p2808_p0 }
  0x69   : > { %2818 = shalt.err (!%p2815_p8)
}
  0x6a   : > { %s3818_s30 = smov 128   ;;  %s3820_s15 = smov 8  }
  0x6b   : > { %2405 = dma.hbm_to_vmem [thread:$0]  (!%p3149_p11), %s3836_s3, 2048, %s342_s13, [#allocation6], %s3818_s30, %s3818_s30, %s3820_s15  }
  0x6c   : > { %s3030_s10 = smov [#allocation11]   ;;  %s2819_s26 = scalar_lea.hbm %s3807_s8, 2048 }
  0x6d   : > { %s373_s11 = sshll.u32 %s3030_s10, 4  ;;  %p2820_p4 = scmp.ne.s32.totalorder %s3807_s8, %s2819_s26  ;;  %s374_s11 = int_to_ptr.vmem [resolvable:$true] %s373_s11 }
  0x6e   : > { %p2826_p10 = scmp.lt.u32.totalorder %s2819_s26, %s3807_s8 }
  0x6f   : > { %p2822_p8 = pnand %p2820_p4, %p3165_p13 }
  0x71   : > { %p2823_p6 = pneg %p2822_p8 }
  0x73   : > { %p2828_p3 = pnand %p2826_p10, %p2823_p6 }
  0x75   : > { %2831 = shalt.err (!%p2828_p3)
}
  0x76   : > { %s2832_s13 = scalar_lea.vmem %s374_s11, 2048  ;;  %p2840_p12 = scmp.lt.s32.totalorder %s374_s11, %s374_s11 }
  0x77   : > { %p2833_p5 = scmp.ne.s32.totalorder %s374_s11, %s2832_s13  ;;  %p2841_p0 = scmp.lt.s32.totalorder %s2832_s13, %s2832_s13 }
  0x79   : > { %p2835_p7 = pnand %p2833_p5, %p3165_p13  ;;  %p2842_p2 = por %p2841_p0, %p2840_p12 }
  0x7b   : > { %p2836_p9 = pneg %p2835_p7 }
  0x7d   : > { %p2843_p1 = pnand %p2842_p2, %p2836_p9 }
  0x7f   : > { %2846 = shalt.err (!%p2843_p1)
}
  0x80   : > { %2411 = dma.hbm_to_vmem [thread:$0]  (!%p3149_p11), %s3807_s8, 2048, %s374_s11, [#allocation12], %s3818_s30, %s3818_s30, %s3820_s15  }
  0x81   : > { %s3253_s24 = sadd.s32 1, %s3021_s20   ;;  %s43_s28 = sadd.s32 1, %s3017_s19 }
  0x82   : > { %s40_s10 = ssub.s32 %s3021_s20, %s3253_s24  ;;  %p50_p13 = scmp.ne.s32.totalorder %s3017_s19, %s3013_s18 }
  0x83   : > { %p41_p4 = scmp.eq.s32.totalorder %s40_s10, 0  ;;  %p51_p8 = scmp.eq.s32.totalorder %s3021_s20, 0 }
  0x84   : > { %p3837_p6 = scmp.eq.s32.totalorder %s3119_s21, 1  ;;  %p2430_p3 = scmp.lt.s32.totalorder %s3021_s20, 2 }
  0x85   : > { %s3269_s22 = scalar_select %p41_p4, %s3017_s19, %s43_s28  }
  0x86   : > { %p3263_p10 = por %p3837_p6, %p50_p13  ;;  %p52_p5 = por %p51_p8, %p50_p13 }
  0x87   : > { %s390_s26 = sand.u32 1, %s3017_s19   ;;  %s2241_s11 = sshll.u32 %s3021_s20, 11 }
  0x88   : > { %s2108_s29 = sshll.u32 %s390_s26, 7  ;;  %s3839_s0 = sld [smem:[#allocation25_spill]] }
  0x89   : > { %s394_s13 = scalar_lea.vmem [#allocation2], %s2108_s29  ;;  %p3280_p11 = pnand %p2430_p3, %p52_p5 }
  0x8a   : > { %s402_s16 = sshll.u32 %s394_s13, 4  ;;  %s3287_s12 = scalar_lea.hbm %s3804_s5, %s2241_s11  ;;  %s3278_s16 = int_to_ptr.vmem [resolvable:$true] %s402_s16 }
  0x8b   : > { %s416_s14 = scalar_lea.vmem [#allocation8], %s2108_s29  ;;  %s3291_s15 = scalar_lea.sflag [#allocation3], %s390_s26 }
  0x8c   : > { %s3289_s30 = sshll.u32 %s416_s14, 4  ;;  %p2849_p9 = pneg %p3280_p11  ;;  %s3323_s30 = int_to_ptr.vmem [resolvable:$true] %s3289_s30 }
  0x8e   : > { %s3276_s27 = scalar_lea.hbm %s3839_s0, %s2241_s11  ;;  %s2852_s28 = scalar_lea.hbm %s3839_s0, 4096 }
  0x8f   : > { %s2847_s13 = scalar_lea.hbm %s3276_s27, 2048  ;;  %p2853_p2 = scmp.lt.u32.totalorder %s3276_s27, %s3839_s0 }
  0x90   : > { %p2848_p7 = scmp.ne.s32.totalorder %s3276_s27, %s2847_s13  ;;  %p2854_p1 = scmp.lt.u32.totalorder %s2852_s28, %s2847_s13 }
  0x91   : > { %p2856_p4 = scmp.lt.u32.totalorder %s2847_s13, %s3276_s27 }
  0x92   : > { %p2850_p12 = pnand %p2849_p9, %p2848_p7  ;;  %p2855_p13 = por %p2854_p1, %p2853_p2 }
  0x94   : > { %p2851_p0 = pneg %p2850_p12  ;;  %p2857_p8 = por %p2856_p4, %p2855_p13 }
  0x96   : > { %p2858_p6 = pnand %p2857_p8, %p2851_p0 }
  0x98   : > { %2861 = shalt.err (!%p2858_p6)
}
  0x99   : > { %s2862_s26 = scalar_lea.vmem %s3278_s16, 2048  ;;  %s3031_s1 = smov [#allocation2]  }
  0x9a   : > { %p2863_p3 = scmp.ne.s32.totalorder %s3278_s16, %s2862_s26  ;;  %s2867_s3 = sshll.u32 %s3031_s1, 4  ;;  %s2868_s3 = int_to_ptr.vmem [resolvable:$false] %s2867_s3 }
  0x9b   : > { %s2869_s29 = scalar_lea.vmem %s2868_s3, 4096  ;;  %p2870_p12 = scmp.lt.s32.totalorder %s3278_s16, %s2868_s3 }
  0x9c   : > { %p2865_p5 = pnand %p2863_p3, %p2849_p9  ;;  %p2871_p2 = scmp.lt.s32.totalorder %s2869_s29, %s2862_s26 }
  0x9e   : > { %p2866_p7 = pneg %p2865_p5  ;;  %p2872_p1 = por %p2871_p2, %p2870_p12 }
  0xa0   : > { %p2873_p13 = pnand %p2872_p1, %p2866_p7 }
  0xa2   : > { %2876 = shalt.err (!%p2873_p13)
}
  0xa3   : > { %s3841_s14 = smov 8   ;;  %s3842_s13 = smov 128  }
  0xa4   : > { %2415 = dma.hbm_to_vmem [thread:$0]  (!%p3280_p11), %s3276_s27, 2048, %s3278_s16, %s3291_s15, %s3842_s13, %s3842_s13, %s3841_s14  }
  0xa5   : > { %s412_s28 = sand.u32 1, %s3021_s20   ;;  %s2877_s11 = scalar_lea.hbm %s3287_s12, 2048 }
  0xa6   : > { %s3326_s10 = scalar_lea.sflag [#allocation9], %s412_s28  ;;  %p2878_p0 = scmp.ne.s32.totalorder %s3287_s12, %s2877_s11 }
  0xa7   : > { %s2882_s3 = scalar_lea.hbm %s3804_s5, 4096  ;;  %p2883_p6 = scmp.lt.u32.totalorder %s3287_s12, %s3804_s5 }
  0xa8   : > { %p2880_p4 = pnand %p2878_p0, %p2849_p9  ;;  %p2884_p3 = scmp.lt.u32.totalorder %s2882_s3, %s2877_s11 }
  0xa9   : > { %p2886_p7 = scmp.lt.u32.totalorder %s2877_s11, %s3287_s12 }
  0xaa   : > { %p2881_p8 = pneg %p2880_p4  ;;  %p2885_p5 = por %p2884_p3, %p2883_p6 }
  0xac   : > { %p2887_p12 = por %p2886_p7, %p2885_p5 }
  0xae   : > { %p2888_p2 = pnand %p2887_p12, %p2881_p8 }
  0xb0   : > { %2891 = shalt.err (!%p2888_p2)
}
  0xb1   : > { %s2892_s15 = scalar_lea.vmem %s3323_s30, 2048  ;;  %s3032_s27 = smov [#allocation8]  }
  0xb2   : > { %p2893_p1 = scmp.ne.s32.totalorder %s3323_s30, %s2892_s15  ;;  %s2897_s16 = sshll.u32 %s3032_s27, 4  ;;  %s2898_s16 = int_to_ptr.vmem [resolvable:$false] %s2897_s16 }
  0xb3   : > { %s2899_s0 = scalar_lea.vmem %s2898_s16, 4096  ;;  %p2900_p4 = scmp.lt.s32.totalorder %s3323_s30, %s2898_s16 }
  0xb4   : > { %p2895_p13 = pnand %p2893_p1, %p2849_p9  ;;  %p2901_p6 = scmp.lt.s32.totalorder %s2899_s0, %s2892_s15 }
  0xb6   : > { %p2896_p0 = pneg %p2895_p13  ;;  %p2902_p3 = por %p2901_p6, %p2900_p4 }
  0xb8   : > { %p2903_p5 = pnand %p2902_p3, %p2896_p0 }
  0xba   : > { %2906 = shalt.err (!%p2903_p5)
}
  0xbb   : > { %2418 = dma.hbm_to_vmem [thread:$0]  (!%p3280_p11), %s3287_s12, 2048, %s3323_s30, %s3326_s10, %s3842_s13, %s3842_s13, %s3841_s14  }
  0xbc   : > { %p3843_p9 = scmp.ne.s32.totalorder %s3832_s25, 0 }
  0xbd   : > { %s3358_s28 = sand.u32 (!%p3843_p9), 1, %s3013_s18   ;;  %p3844_p8 = scmp.ne.s32.totalorder (!%p3843_p9), %s3829_s23, 0 }
  0xbe   : > { %435 = sbr.rel (%p3843_p9) target bundleno = 1250 (0x4e2), region = 60  ;;  %s2116_s11 = sshll.u32 (!%p3843_p9), %s3358_s28, 7 }
  0xbf   : > { %s438_s26 = scalar_lea.sflag (!%p3843_p9), [#allocation3], %s3358_s28  ;;  %s3362_s1 = scalar_lea.vmem (!%p3843_p9), [#allocation2], %s2116_s11 }
  0xc5   : > { %2980 = dma.done.wait (%p3844_p8), %s438_s26, 2048  }
  0xc6   : > { %2982 = vsyncadd (%p3844_p8), %s438_s26, 4294965248  ;;  %p3845_p11 = scmp.eq.s32.totalorder %s3119_s21, 0 }
  0xc8   : > { %2984 = dma.done.wait (%p3845_p11), [#allocation6], 4096   ;;  %p3846_p7 = pmov %p3845_p11 }
  0xc9   : > { %s454_s25 = sand.u32 1, %s3119_s21   ;;  %s3373_s9 = scalar_lea.vmem [#allocation8], %s2116_s11 }
  0xca   : > { %2986 = vsyncadd (%p3846_p7), [#allocation6], 4294963200  ;;  %s455_s30 = scalar_lea.sflag [#allocation9], %s454_s25 }
  0xcb   : > { %2988 = dma.done.wait (%p3844_p8), %s455_s30, 2048  }
  0xcc   : > { %2990 = vsyncadd (%p3844_p8), %s455_s30, 4294965248  ;;  %p3847_p12 = pmov %p3846_p7 }
  0xcd   : > { %p3848_p2 = pmov %p3846_p7 }
  0xce   : > { %2992 = dma.done.wait (%p3847_p12), [#allocation9], 1024  }
  0xcf   : > { %2994 = vsyncadd (%p3848_p2), [#allocation9], 4294966272  ;;  %p3849_p1 = pmov %p3848_p2 }
  0xd1   : > { %2996 = dma.done.wait (%p3849_p1), [#allocation12], 2048   ;;  %p3850_p13 = pmov %p3849_p1 }
  0xd2   : > { %v2479_v0 = vld [vmem:[#allocation5 + $0x40] sm:$0xff]   ;;  %v2481_v2 = vld [vmem:[#allocation5 + $0x48] sm:$0xff]   ;;  %v2483_v4 = vld [vmem:[#allocation5 + $0x50] sm:$0xff]   ;;  %v3033_v48 = vmov 0   ;;  %s2122_s10 = sshll.u32 %s3358_s28, 8  ;;  %s2244_s27 = sshll.u32 %s3119_s21, 12 }
  0xd3   : > { %2998 = vsyncadd (%p3850_p13), [#allocation12], 4294965248  ;;  %v2480_v1 = vld [vmem:[#allocation5] sm:$0xff]   ;;  %2247 = vmatprep.subr.bf16.mxu0 %v2479_v0  ;;  %v2482_v3 = vld [vmem:[#allocation5 + $0x8] sm:$0xff]   ;;  %1044 = vmatprep.mubr.bf16.mxu1 %v3033_v48  ;;  %s3486_s3 = scalar_lea.vmem [#allocation14], %s2122_s10  ;;  %s3851_s11 = sld [smem:[#allocation30_spill]] }
  0xd4   : > { %2248 = vmatpush3.bf16.msra.mxu0 %v2480_v1  ;;  %v2484_v5 = vld [vmem:[#allocation5 + $0x10] sm:$0xff]   ;;  %v2485_v6 = vld [vmem:[#allocation5 + $0x58] sm:$0xff]   ;;  %v2487_v8 = vld [vmem:[#allocation5 + $0x60] sm:$0xff]   ;;  %s1904_s25 = scalar_lea.sflag [#allocation15], %s3358_s28 }
  0xd5   : > { %2249 = vmatprep.subr.bf16.mxu0 %v2481_v2  ;;  %v2486_v7 = vld [vmem:[#allocation5 + $0x18] sm:$0xff]   ;;  %v2488_v9 = vld [vmem:[#allocation5 + $0x20] sm:$0xff]   ;;  %v2489_v10 = vld [vmem:[#allocation5 + $0x68] sm:$0xff]  }
  0xd6   : > { %v2497_v11 = vld [vmem:[%s3362_s1 + $0x4] ss:$8 sps:$4 sm:$0xff]   ;;  %v2491_v13 = vld [vmem:[#allocation5 + $0x70] sm:$0xff]   ;;  %v2493_v15 = vld [vmem:[#allocation5 + $0x78] sm:$0xff]  }
  0xd7   : > { %v2490_v12 = vld [vmem:[#allocation5 + $0x28] sm:$0xff]   ;;  %783 = vmatprep.mubr.bf16.mxu0 %v2497_v11  ;;  %v2492_v14 = vld [vmem:[#allocation5 + $0x30] sm:$0xff]   ;;  %v2494_v16 = vld [vmem:[#allocation5 + $0x38] sm:$0xff]  }
  0xd8   : > { %2250 = vmatpush3.bf16.msra.mxu0 %v2482_v3  ;;  %v2519_v17 = vld [vmem:[#allocation7 + $0x4] ss:$8 sps:$4 sm:$0xff]   ;;  %v2521_v18 = vld [vmem:[#allocation7] ss:$8 sps:$4 sm:$0xff]   ;;  %v2522_v19 = vld [vmem:[#allocation7 + $0x14] ss:$8 sps:$4 sm:$0xff]  }
  0xd9   : > { %2251 = vmatprep.subr.bf16.mxu0 %v2483_v4  ;;  %1012 = vmatprep.subr.bf16.mxu1 %v2519_v17  ;;  %v2495_v20 = vld [vmem:[%s3362_s1] ss:$8 sps:$4 sm:$0xff]   ;;  %v2524_v21 = vld [vmem:[#allocation7 + $0x10] ss:$8 sps:$4 sm:$0xff]   ;;  %v2498_v22 = vld [vmem:[%s3362_s1 + $0x14] ss:$8 sps:$4 sm:$0xff]   ;;  %s3633_s26 = scalar_lea.hbm %s3851_s11, %s2244_s27 }
  0xda   : > { %1013 = vmatpush1.bf16.msra.mxu1 %v2521_v18  ;;  %v2525_v23 = vld [vmem:[#allocation7 + $0x24] ss:$8 sps:$4 sm:$0xff]   ;;  %v2527_v24 = vld [vmem:[#allocation7 + $0x20] ss:$8 sps:$4 sm:$0xff]   ;;  %v2528_v25 = vld [vmem:[#allocation7 + $0x34] ss:$8 sps:$4 sm:$0xff]  }
  0xdb   : > { %1014 = vmatprep.subr.bf16.mxu1 %v2522_v19  ;;  %v2500_v26 = vld [vmem:[%s3362_s1 + $0x10] ss:$8 sps:$4 sm:$0xff]   ;;  %v2501_v28 = vld [vmem:[%s3362_s1 + $0x24] ss:$8 sps:$4 sm:$0xff]   ;;  %v2533_v30 = vld [vmem:[#allocation7 + $0x40] ss:$8 sps:$4 sm:$0xff]  }
  0xdc   : > { %2252 = vmatpush3.bf16.msra.mxu0 %v2484_v5  ;;  %v2530_v27 = vld [vmem:[#allocation7 + $0x30] ss:$8 sps:$4 sm:$0xff]   ;;  %v2531_v29 = vld [vmem:[#allocation7 + $0x44] ss:$8 sps:$4 sm:$0xff]   ;;  %v2503_v31 = vld [vmem:[%s3362_s1 + $0x20] ss:$8 sps:$4 sm:$0xff]  }
  0xdd   : > { %2253 = vmatprep.subr.bf16.mxu0 %v2485_v6  ;;  %v2504_v32 = vld [vmem:[%s3362_s1 + $0x34] ss:$8 sps:$4 sm:$0xff]   ;;  %v2506_v33 = vld [vmem:[%s3362_s1 + $0x30] ss:$8 sps:$4 sm:$0xff]   ;;  %v2507_v34 = vld [vmem:[%s3362_s1 + $0x44] ss:$8 sps:$4 sm:$0xff]  }
  0xde   : > { %1015 = vmatpush1.bf16.msra.mxu1 %v2524_v21  ;;  %v2509_v35 = vld [vmem:[%s3362_s1 + $0x40] ss:$8 sps:$4 sm:$0xff]   ;;  %v2510_v36 = vld [vmem:[%s3362_s1 + $0x54] ss:$8 sps:$4 sm:$0xff]   ;;  %v2512_v37 = vld [vmem:[%s3362_s1 + $0x50] ss:$8 sps:$4 sm:$0xff]  }
  0xdf   : > { %1016 = vmatprep.subr.bf16.mxu1 %v2525_v23  ;;  %v2513_v38 = vld [vmem:[%s3362_s1 + $0x64] ss:$8 sps:$4 sm:$0xff]   ;;  %v2515_v39 = vld [vmem:[%s3362_s1 + $0x60] ss:$8 sps:$4 sm:$0xff]   ;;  %v2516_v40 = vld [vmem:[%s3362_s1 + $0x74] ss:$8 sps:$4 sm:$0xff]  }
  0xe0   : > { %2254 = vmatpush3.bf16.msra.mxu0 %v2486_v7  ;;  %v2518_v41 = vld [vmem:[%s3362_s1 + $0x70] ss:$8 sps:$4 sm:$0xff]   ;;  %v2534_v42 = vld [vmem:[#allocation7 + $0x54] ss:$8 sps:$4 sm:$0xff]   ;;  %v2537_v44 = vld [vmem:[#allocation7 + $0x64] ss:$8 sps:$4 sm:$0xff]  }
  0xe1   : > { %2255 = vmatprep.subr.bf16.mxu0 %v2487_v8  ;;  %v2536_v43 = vld [vmem:[#allocation7 + $0x50] ss:$8 sps:$4 sm:$0xff]   ;;  %v2539_v45 = vld [vmem:[#allocation7 + $0x60] ss:$8 sps:$4 sm:$0xff]   ;;  %v2540_v46 = vld [vmem:[#allocation7 + $0x74] ss:$8 sps:$4 sm:$0xff]  }
  0xe2   : > { %1017 = vmatpush1.bf16.msra.mxu1 %v2527_v24  ;;  %v2542_v47 = vld [vmem:[#allocation7 + $0x70] ss:$8 sps:$4 sm:$0xff]   ;;  %v2543_v49 = vld [vmem:[#allocation10] sm:$0xff]   ;;  %v2544_v50 = vld [vmem:[#allocation10 + $0x8] sm:$0xff]   ;;  %s1935_s1 = sshll.u32 %s3486_s3, 4  ;;  %s3636_s1 = int_to_ptr.vmem [resolvable:$true] %s1935_s1 }
  0xe3   : > { %1018 = vmatprep.subr.bf16.mxu1 %v2528_v25  ;;  %v2545_v51 = vld [vmem:[#allocation10 + $0x10] sm:$0xff]   ;;  %v3407_v53 = vld [vmem:[%s3801_s2] ss:$0 sm:$0xff]  ;;  %s2907_s30 = scalar_lea.vmem %s3636_s1, 4096 }
  0xe4   : > { %2256 = vmatpush3.bf16.msra.mxu0 %v2488_v9  ;;  %p2908_p0 = scmp.ne.s32.totalorder %s3636_s1, %s2907_s30 }
  0xe5   : > { %2257 = vmatprep.subr.bf16.mxu0 %v2489_v10 }
  0xe6   : > { %1019 = vmatpush1.bf16.msra.mxu1 %v2530_v27  ;;  %p2909_p4 = pnand %p2908_p0, %p3263_p10 }
  0xe7   : > { %1020 = vmatprep.subr.bf16.mxu1 %v2531_v29 }
  0xe8   : > { %2258 = vmatpush3.bf16.msra.mxu0 %v2490_v12  ;;  %p2910_p6 = pneg %p2909_p4 }
  0xe9   : > { %2259 = vmatprep.subr.bf16.mxu0 %v2491_v13 }
  0xea   : > { %1021 = vmatpush1.bf16.msra.mxu1 %v2533_v30 }
  0xeb   : > { %1022 = vmatprep.subr.bf16.mxu1 %v2534_v42 }
  0xec   : > { %2260 = vmatpush3.bf16.msra.mxu0 %v2492_v14 }
  0xed   : > { %2261 = vmatprep.subr.bf16.mxu0 %v2493_v15 }
  0xee   : > { %1023 = vmatpush1.bf16.msra.mxu1 %v2536_v43 }
  0xef   : > { %1024 = vmatprep.subr.bf16.mxu1 %v2537_v44 }
  0xf0   : > { %2262 = vmatpush3.bf16.msra.mxu0 %v2494_v16 }
  0xf1   : > { %2327 = vmatprep.subr.bf16.mxu0 %v2543_v49 }
  0xf2   : > { %1025 = vmatpush1.bf16.msra.mxu1 %v2539_v45 }
  0xf3   : > { %784 = vmatmul.mubr.bf16.vlgmr.msra.gmra.mrb[0].mxu0 %v2495_v20  ;;  %1026 = vmatprep.subr.bf16.mxu1 %v2540_v46 }
  0xf4   : > { %791 = vmatprep.mubr.bf16.mxu0 %v2498_v22  ;;  %2328 = vmatpush3.bf16.msra.mxu0 %v2543_v49 }
  0xf5   : > { %2329 = vmatprep.subr.bf16.mxu0 %v2544_v50 }
  0xf6   : > { %1027 = vmatpush1.bf16.msra.mxu1 %v2542_v47 }
  0xf8   : > { %2330 = vmatpush3.bf16.msra.mxu0 %v2544_v50 }
  0xf9   : > { %2331 = vmatprep.subr.bf16.mxu0 %v2545_v51 }
  0xfb   : > { %792 = vmatmul.mubr.bf16.gmra.mrb[4].mxu0 %v2500_v26 }
  0xfc   : > { %799 = vmatprep.mubr.bf16.mxu0 %v2501_v28  ;;  %2332 = vmatpush3.bf16.msra.mxu0 %v2545_v51 }
 0x103   : > { %800 = vmatmul.mubr.bf16.gmra.mrb[8].mxu0 %v2503_v31 }
 0x104   : > { %807 = vmatprep.mubr.bf16.mxu0 %v2504_v32 }
 0x10b   : > { %808 = vmatmul.mubr.bf16.gmra.mrb[12].mxu0 %v2506_v33 }
 0x10c   : > { %815 = vmatprep.mubr.bf16.mxu0 %v2507_v34 }
 0x113   : > { %816 = vmatmul.mubr.bf16.gmra.mrb[16].mxu0 %v2509_v35 }
 0x114   : > { %823 = vmatprep.mubr.bf16.mxu0 %v2510_v36 }
 0x11b   : > { %824 = vmatmul.mubr.bf16.gmra.mrb[20].mxu0 %v2512_v37 }
 0x11c   : > { %831 = vmatprep.mubr.bf16.mxu0 %v2513_v38 }
 0x123   : > { %832 = vmatmul.mubr.bf16.gmra.mrb[24].mxu0 %v2515_v39 }
 0x124   : > { %839 = vmatprep.mubr.bf16.mxu0 %v2516_v40 }
 0x12b   : > { %840 = vmatmul.mubr.bf16.gmra.mrb[28].mxu0 %v2518_v41 }
 0x1c6   : > { %v2263_v52 = vpop.f32.mrb[0].mxu0 }
 0x1c7   : > { %v2264_v54 = vpop.f32.mrb[1].mxu0 }
 0x1c8   : > { %v2265_v55 = vadd.f32 %v2264_v54, %v2263_v52  ;;  %v2266_v56 = vpop.f32.mrb[2].mxu0 }
 0x1c9   : > { %v2267_v57 = vpop.f32.mrb[3].mxu0 }
 0x1ca   : > { %v786_v58 = vadd.f32 %v2265_v55, %v3407_v53  ;;  %v2268_v59 = vadd.f32 %v2267_v57, %v2266_v56 }
 0x1cc   : > { %v864_v60 = vmul.f32 0.2, %v786_v58  ;;  %v789_v61 = vadd.f32 %v2268_v59, %v3407_v53  ;;  %vm848_vm0 = vcmp.gt.f32.partialorder %v786_v58, 0.0 }
 0x1ce   : > { %vm849_vm1 = vcmp.gt.f32.partialorder %v789_v61, 0.0  ;;  %v865_v62 = vmul.f32 0.2, %v789_v61  ;;  %v2269_v63 = vpop.f32.mrb[4].mxu0  ;;  %v880_v3 = vsel %vm848_vm0, %v786_v58, %v864_v60 }
 0x1cf   : > { %v2270_v0 = vpop.f32.mrb[5].mxu0 }
 0x1d0   : > { %v2271_v1 = vadd.f32 %v2270_v0, %v2269_v63  ;;  %v2272_v2 = vpop.f32.mrb[6].mxu0  ;;  %v881_v4 = vsel %vm849_vm1, %v789_v61, %v865_v62 }
 0x1d1   : > { %v2273_v5 = vpop.f32.mrb[7].mxu0  ;;  %v896_v6 = vpack.c.bf16 %v881_v4, %v880_v3 }
 0x1d2   : > { %v794_v7 = vadd.f32 %v2271_v1, %v3407_v53  ;;  %v2274_v8 = vadd.f32 %v2273_v5, %v2272_v2 }
 0x1d3   : > { %1045 = vmatmul.mubr.bf16.vlgmr.msra.gmra.mrb[0].mxu1 %v896_v6 }
 0x1d4   : > { %v866_v9 = vmul.f32 0.2, %v794_v7  ;;  %v797_v10 = vadd.f32 %v2274_v8, %v3407_v53  ;;  %1054 = vmatprep.mubr.bf16.mxu1 %v3033_v48  ;;  %vm850_vm2 = vcmp.gt.f32.partialorder %v794_v7, 0.0 }
 0x1d6   : > { %vm851_vm3 = vcmp.gt.f32.partialorder %v797_v10, 0.0  ;;  %v867_v11 = vmul.f32 0.2, %v797_v10  ;;  %v2275_v12 = vpop.f32.mrb[8].mxu0  ;;  %v882_v16 = vsel %vm850_vm2, %v794_v7, %v866_v9 }
 0x1d7   : > { %v2276_v13 = vpop.f32.mrb[9].mxu0 }
 0x1d8   : > { %v2277_v14 = vadd.f32 %v2276_v13, %v2275_v12  ;;  %v2278_v15 = vpop.f32.mrb[10].mxu0  ;;  %v883_v17 = vsel %vm851_vm3, %v797_v10, %v867_v11 }
 0x1d9   : > { %v2279_v18 = vpop.f32.mrb[11].mxu0  ;;  %v897_v19 = vpack.c.bf16 %v883_v17, %v882_v16 }
 0x1da   : > { %v802_v20 = vadd.f32 %v2277_v14, %v3407_v53  ;;  %v2280_v21 = vadd.f32 %v2279_v18, %v2278_v15 }
 0x1db   : > { %1055 = vmatmul.mubr.bf16.gmra.mrb[4].mxu1 %v897_v19 }
 0x1dc   : > { %v868_v22 = vmul.f32 0.2, %v802_v20  ;;  %v805_v23 = vadd.f32 %v2280_v21, %v3407_v53  ;;  %1064 = vmatprep.mubr.bf16.mxu1 %v3033_v48  ;;  %vm852_vm4 = vcmp.gt.f32.partialorder %v802_v20, 0.0 }
 0x1de   : > { %vm853_vm5 = vcmp.gt.f32.partialorder %v805_v23, 0.0  ;;  %v869_v24 = vmul.f32 0.2, %v805_v23  ;;  %v2281_v25 = vpop.f32.mrb[12].mxu0  ;;  %v884_v29 = vsel %vm852_vm4, %v802_v20, %v868_v22 }
 0x1df   : > { %v2282_v26 = vpop.f32.mrb[13].mxu0 }
 0x1e0   : > { %v2283_v27 = vadd.f32 %v2282_v26, %v2281_v25  ;;  %v2284_v28 = vpop.f32.mrb[14].mxu0  ;;  %v885_v30 = vsel %vm853_vm5, %v805_v23, %v869_v24 }
 0x1e1   : > { %v2285_v31 = vpop.f32.mrb[15].mxu0  ;;  %v898_v32 = vpack.c.bf16 %v885_v30, %v884_v29 }
 0x1e2   : > { %v810_v33 = vadd.f32 %v2283_v27, %v3407_v53  ;;  %v2286_v34 = vadd.f32 %v2285_v31, %v2284_v28  ;;  %v2546_v31 = vld [vmem:[#allocation10 + $0x18] sm:$0xff]  }
 0x1e3   : > { %1065 = vmatmul.mubr.bf16.gmra.mrb[8].mxu1 %v898_v32  ;;  %2333 = vmatprep.subr.bf16.mxu0 %v2546_v31  ;;  %v2547_v32 = vld [vmem:[#allocation10 + $0x20] sm:$0xff]  }
 0x1e4   : > { %v870_v35 = vmul.f32 0.2, %v810_v33  ;;  %v813_v36 = vadd.f32 %v2286_v34, %v3407_v53  ;;  %1074 = vmatprep.mubr.bf16.mxu1 %v3033_v48  ;;  %vm854_vm6 = vcmp.gt.f32.partialorder %v810_v33, 0.0  ;;  %2334 = vmatpush3.bf16.msra.mxu0 %v2546_v31  ;;  %v2550_v34 = vld [vmem:[#allocation10 + $0x38] sm:$0xff]  }
 0x1e5   : > { %2335 = vmatprep.subr.bf16.mxu0 %v2547_v32 }
 0x1e6   : > { %vm855_vm7 = vcmp.gt.f32.partialorder %v813_v36, 0.0  ;;  %v871_v37 = vmul.f32 0.2, %v813_v36  ;;  %v2287_v38 = vpop.f32.mrb[16].mxu0  ;;  %v886_v42 = vsel %vm854_vm6, %v810_v33, %v870_v35  ;;  %v2548_v33 = vld [vmem:[#allocation10 + $0x28] sm:$0xff]  }
 0x1e7   : > { %v2288_v39 = vpop.f32.mrb[17].mxu0  ;;  %v2553_v35 = vld [vmem:[#allocation11 + $0x4] ss:$8 sps:$4 sm:$0xff]  }
 0x1e8   : > { %v2289_v40 = vadd.f32 %v2288_v39, %v2287_v38  ;;  %v2290_v41 = vpop.f32.mrb[18].mxu0  ;;  %v887_v43 = vsel %vm855_vm7, %v813_v36, %v871_v37  ;;  %2336 = vmatpush3.bf16.msra.mxu0 %v2547_v32  ;;  %v3433_v36 = vld [vmem:[#allocation11] ss:$8 sps:$4 sm:$0xff]   ;;  %2359 = vmatprep.subr.bf16.mxu1 %v2553_v35  ;;  %v3435_v37 = vld [vmem:[#allocation11 + $0x14] ss:$8 sps:$4 sm:$0xff]  }
 0x1e9   : > { %v2291_v44 = vpop.f32.mrb[19].mxu0  ;;  %v899_v45 = vpack.c.bf16 %v887_v43, %v886_v42  ;;  %2337 = vmatprep.subr.bf16.mxu0 %v2548_v33  ;;  %2367 = vmatpush1.bf16.msra.mxu1 %v3433_v36  ;;  %v3439_v38 = vld [vmem:[#allocation11 + $0x10] ss:$8 sps:$4 sm:$0xff]   ;;  %v3441_v39 = vld [vmem:[#allocation11 + $0x24] ss:$8 sps:$4 sm:$0xff]  }
 0x1ea   : > { %v818_v46 = vadd.f32 %v2289_v40, %v3407_v53  ;;  %v2292_v47 = vadd.f32 %v2291_v44, %v2290_v41  ;;  %2360 = vmatprep.subr.bf16.mxu1 %v3435_v37  ;;  %v3445_v40 = vld [vmem:[#allocation11 + $0x20] ss:$8 sps:$4 sm:$0xff]   ;;  %v3447_v41 = vld [vmem:[#allocation11 + $0x34] ss:$8 sps:$4 sm:$0xff]   ;;  %v3451_v42 = vld [vmem:[#allocation11 + $0x30] ss:$8 sps:$4 sm:$0xff]  }
 0x1eb   : > { %1075 = vmatmul.mubr.bf16.gmra.mrb[12].mxu1 %v899_v45  ;;  %v3453_v43 = vld [vmem:[#allocation11 + $0x44] ss:$8 sps:$4 sm:$0xff]   ;;  %v3457_v44 = vld [vmem:[#allocation11 + $0x40] ss:$8 sps:$4 sm:$0xff]   ;;  %v3459_v45 = vld [vmem:[#allocation11 + $0x54] ss:$8 sps:$4 sm:$0xff]  }
 0x1ec   : > { %v872_v49 = vmul.f32 0.2, %v818_v46  ;;  %v821_v50 = vadd.f32 %v2292_v47, %v3407_v53  ;;  %1084 = vmatprep.mubr.bf16.mxu1 %v3033_v48  ;;  %vm856_vm8 = vcmp.gt.f32.partialorder %v818_v46, 0.0  ;;  %2338 = vmatpush3.bf16.msra.mxu0 %v2548_v33  ;;  %v922_v47 = vlaneseq }
 0x1ed   : > { %2368 = vmatpush1.bf16.msra.mxu1 %v3439_v38 }
 0x1ee   : > { %vm857_vm9 = vcmp.gt.f32.partialorder %v821_v50, 0.0  ;;  %v873_v51 = vmul.f32 0.2, %v821_v50  ;;  %v2293_v52 = vpop.f32.mrb[20].mxu0  ;;  %v888_v57 = vsel %vm856_vm8, %v818_v46, %v872_v49  ;;  %2361 = vmatprep.subr.bf16.mxu1 %v3441_v39  ;;  %v3463_v46 = vld [vmem:[#allocation11 + $0x50] ss:$8 sps:$4 sm:$0xff]  }
 0x1ef   : > { %v2294_v54 = vpop.f32.mrb[21].mxu0  ;;  %v3466_v49 = vshrl.u32 %v922_v47, 7 }
 0x1f0   : > { %v2295_v55 = vadd.f32 %v2294_v54, %v2293_v52  ;;  %v2296_v56 = vpop.f32.mrb[22].mxu0  ;;  %v889_v58 = vsel %vm857_vm9, %v821_v50, %v873_v51  ;;  %v920_v51 = vld [vmem:[%s3803_s4] sm:$0x3] }
 0x1f1   : > { %v2297_v59 = vpop.f32.mrb[23].mxu0  ;;  %v900_v60 = vpack.c.bf16 %v889_v58, %v888_v57  ;;  %2369 = vmatpush1.bf16.msra.mxu1 %v3445_v40  ;;  %v924_v50 = vsub.s32 0, %v3466_v49  ;;  %v928_v52 = vsub.s32 1, %v3466_v49 }
 0x1f2   : > { %v826_v61 = vadd.f32 %v2295_v55, %v3407_v53  ;;  %v2298_v62 = vadd.f32 %v2297_v59, %v2296_v56  ;;  %2362 = vmatprep.subr.bf16.mxu1 %v3447_v41 }
 0x1f3   : > { %1085 = vmatmul.mubr.bf16.gmra.mrb[16].mxu1 %v900_v60  ;;  %v3476_v54 = vrot.slane %v920_v51, %v924_v50  ;;  %v3480_v55 = vrot.slane %v920_v51, %v928_v52 }
 0x1f4   : > { %v874_v63 = vmul.f32 0.2, %v826_v61  ;;  %v829_v0 = vadd.f32 %v2298_v62, %v3407_v53  ;;  %1094 = vmatprep.mubr.bf16.mxu1 %v3033_v48  ;;  %vm858_vm10 = vcmp.gt.f32.partialorder %v826_v61, 0.0 }
 0x1f5   : > { %2370 = vmatpush1.bf16.msra.mxu1 %v3451_v42 }
 0x1f6   : > { %vm859_vm11 = vcmp.gt.f32.partialorder %v829_v0, 0.0  ;;  %v875_v1 = vmul.f32 0.2, %v829_v0  ;;  %v2299_v2 = vpop.f32.mrb[24].mxu0  ;;  %v890_v6 = vsel %vm858_vm10, %v826_v61, %v874_v63  ;;  %2363 = vmatprep.subr.bf16.mxu1 %v3453_v43 }
 0x1f7   : > { %v2300_v3 = vpop.f32.mrb[25].mxu0 }
 0x1f8   : > { %v2301_v4 = vadd.f32 %v2300_v3, %v2299_v2  ;;  %v2302_v5 = vpop.f32.mrb[26].mxu0  ;;  %v891_v7 = vsel %vm859_vm11, %v829_v0, %v875_v1 }
 0x1f9   : > { %v2303_v8 = vpop.f32.mrb[27].mxu0  ;;  %v901_v9 = vpack.c.bf16 %v891_v7, %v890_v6  ;;  %2371 = vmatpush1.bf16.msra.mxu1 %v3457_v44 }
 0x1fa   : > { %v834_v10 = vadd.f32 %v2301_v4, %v3407_v53  ;;  %v2304_v11 = vadd.f32 %v2303_v8, %v2302_v5  ;;  %2364 = vmatprep.subr.bf16.mxu1 %v3459_v45 }
 0x1fb   : > { %1095 = vmatmul.mubr.bf16.gmra.mrb[20].mxu1 %v901_v9 }
 0x1fc   : > { %v876_v12 = vmul.f32 0.2, %v834_v10  ;;  %v837_v13 = vadd.f32 %v2304_v11, %v3407_v53  ;;  %1104 = vmatprep.mubr.bf16.mxu1 %v3033_v48  ;;  %vm860_vm12 = vcmp.gt.f32.partialorder %v834_v10, 0.0 }
 0x1fd   : > { %2372 = vmatpush1.bf16.msra.mxu1 %v3463_v46 }
 0x1fe   : > { %vm861_vm13 = vcmp.gt.f32.partialorder %v837_v13, 0.0  ;;  %v877_v14 = vmul.f32 0.2, %v837_v13  ;;  %v2305_v15 = vpop.f32.mrb[28].mxu0  ;;  %v892_v19 = vsel %vm860_vm12, %v834_v10, %v876_v12 }
 0x1ff   : > { %v2306_v16 = vpop.f32.mrb[29].mxu0 }
 0x200   : > { %v2307_v17 = vadd.f32 %v2306_v16, %v2305_v15  ;;  %v2308_v18 = vpop.f32.mrb[30].mxu0  ;;  %v893_v20 = vsel %vm861_vm13, %v837_v13, %v877_v14 }
 0x201   : > { %v2309_v21 = vpop.f32.mrb[31].mxu0  ;;  %v902_v22 = vpack.c.bf16 %v893_v20, %v892_v19 }
 0x202   : > { %v842_v23 = vadd.f32 %v2307_v17, %v3407_v53  ;;  %v2310_v24 = vadd.f32 %v2309_v21, %v2308_v18  ;;  %v1157_v17 = vld [vmem:[%s3373_s9] sm:$0xff] }
 0x203   : > { %1105 = vmatmul.mubr.bf16.gmra.mrb[24].mxu1 %v902_v22 }
 0x204   : > { %v878_v25 = vmul.f32 0.2, %v842_v23  ;;  %v845_v26 = vadd.f32 %v2310_v24, %v3407_v53  ;;  %1114 = vmatprep.mubr.bf16.mxu1 %v3033_v48  ;;  %vm862_vm14 = vcmp.gt.f32.partialorder %v842_v23, 0.0  ;;  %v2549_v53 = vld [vmem:[#allocation10 + $0x30] sm:$0xff]  }
 0x205   : > { %2339 = vmatprep.subr.bf16.mxu0 %v2549_v53 }
 0x206   : > { %vm863_vm15 = vcmp.gt.f32.partialorder %v845_v26, 0.0  ;;  %v879_v27 = vmul.f32 0.2, %v845_v26  ;;  %v894_v28 = vsel %vm862_vm14, %v842_v23, %v878_v25  ;;  %2340 = vmatpush3.bf16.msra.mxu0 %v2549_v53  ;;  %v1158_v23 = vld [vmem:[%s3373_s9 + $0x8] sm:$0xff] }
 0x207   : > { %2341 = vmatprep.subr.bf16.mxu0 %v2550_v34 }
 0x208   : > { %v895_v29 = vsel %vm863_vm15, %v845_v26, %v879_v27 }
 0x209   : > { %v903_v30 = vpack.c.bf16 %v895_v29, %v894_v28 }
 0x20a   : > { %2342 = vmatpush3.bf16.msra.mxu0 %v2550_v34  ;;  %v1159_v34 = vld [vmem:[%s3373_s9 + $0x10] sm:$0xff] }
 0x20b   : > { %1115 = vmatmul.mubr.bf16.gmra.mrb[28].mxu1 %v903_v30  ;;  %1561 = vmatprep.subr.bf16.mxu0 %v2553_v35 }
 0x20c   : > { %1613 = vmatprep.mubr.bf16.mxu1 %v3033_v48 }
 0x2a6   : > { %v1046_v56 = vpop.f32.mrb[0].mxu1 }
 0x2a7   : > { %v1047_v57 = vadd.f32 %v1046_v56, %v3476_v54  ;;  %v1048_v58 = vpop.f32.mrb[1].mxu1 }
 0x2a8   : > { %v1049_v59 = vadd.f32 %v1048_v58, %v3480_v55  ;;  %v1050_v60 = vpop.f32.mrb[2].mxu1 }
 0x2a9   : > { %1125 = vst [vmem:[%s3486_s3] sm:$0xff] %v1047_v57  ;;  %v1051_v61 = vadd.f32 %v1050_v60, %v3476_v54  ;;  %v1052_v62 = vpop.f32.mrb[3].mxu1  ;;  %v1160_v60 = vld [vmem:[%s3373_s9 + $0x18] sm:$0xff] }
 0x2aa   : > { %1126 = vst [vmem:[%s3486_s3 + $0x8] sm:$0xff] %v1049_v59  ;;  %v1173_v63 = vmul.f32 0.5, %v1049_v59  ;;  %v1053_v0 = vadd.f32 %v1052_v62, %v3480_v55 }
 0x2ab   : > { %1127 = vst [vmem:[%s3486_s3 + $0x10] sm:$0xff] %v1051_v61 }
 0x2ac   : > { %v1189_v1 = vmul.f32 1.442695, %v1173_v63  ;;  %1128 = vst [vmem:[%s3486_s3 + $0x18] sm:$0xff] %v1053_v0  ;;  %v1174_v2 = vmul.f32 0.5, %v1053_v0 }
 0x2ae   : > { %2575 = vpow2.f32 %v1189_v1  ;;  %v1191_v3 = vmul.f32 1.442695, %v1174_v2  ;;  %v1056_v4 = vpop.f32.mrb[4].mxu1 }
 0x2af   : > { %v3495_v5 = vadd.f32 %v1056_v4, %v3476_v54  ;;  %v1058_v6 = vpop.f32.mrb[5].mxu1 }
 0x2b0   : > { %2577 = vpow2.f32 %v1191_v3  ;;  %v1059_v7 = vadd.f32 %v1058_v6, %v3480_v55  ;;  %v1060_v8 = vpop.f32.mrb[6].mxu1 }
 0x2b1   : > { %1129 = vst [vmem:[%s3486_s3 + $0x20] sm:$0xff] %v3495_v5  ;;  %v1061_v9 = vadd.f32 %v1060_v8, %v3476_v54  ;;  %v1062_v10 = vpop.f32.mrb[7].mxu1 }
 0x2b2   : > { %1130 = vst [vmem:[%s3486_s3 + $0x28] sm:$0xff] %v1059_v7  ;;  %v1175_v11 = vmul.f32 0.5, %v1059_v7  ;;  %v1063_v12 = vadd.f32 %v1062_v10, %v3480_v55 }
 0x2b3   : > { %1131 = vst [vmem:[%s3486_s3 + $0x30] sm:$0xff] %v1061_v9 }
 0x2b4   : > { %v1193_v13 = vmul.f32 1.442695, %v1175_v11  ;;  %1132 = vst [vmem:[%s3486_s3 + $0x38] sm:$0xff] %v1063_v12  ;;  %v1176_v14 = vmul.f32 0.5, %v1063_v12 }
 0x2b6   : > { %2579 = vpow2.f32 %v1193_v13  ;;  %v1195_v15 = vmul.f32 1.442695, %v1176_v14  ;;  %v1066_v16 = vpop.f32.mrb[8].mxu1  ;;  %v1161_v13 = vld [vmem:[%s3373_s9 + $0x20] sm:$0xff] }
 0x2b7   : > { %v3507_v18 = vadd.f32 %v1066_v16, %v3476_v54  ;;  %v1068_v19 = vpop.f32.mrb[9].mxu1 }
 0x2b8   : > { %v2576_v20 = vpop.eup %2575  ;;  %2581 = vpow2.f32 %v1195_v15  ;;  %v1069_v21 = vadd.f32 %v1068_v19, %v3480_v55  ;;  %v1070_v22 = vpop.f32.mrb[10].mxu1 }
 0x2b9   : > { %1133 = vst [vmem:[%s3486_s3 + $0x40] sm:$0xff] %v3507_v18  ;;  %v3514_v24 = vadd.f32 %v1070_v22, %v3476_v54  ;;  %v1072_v25 = vpop.f32.mrb[11].mxu1  ;;  %v1221_v26 = vmul.f32 %v2576_v20, %v1157_v17  ;;  %v1162_v20 = vld [vmem:[%s3373_s9 + $0x28] sm:$0xff] }
 0x2ba   : > { %v2578_v27 = vpop.eup %2577  ;;  %1134 = vst [vmem:[%s3486_s3 + $0x48] sm:$0xff] %v1069_v21  ;;  %v1177_v28 = vmul.f32 0.5, %v1069_v21  ;;  %v1073_v29 = vadd.f32 %v1072_v25, %v3480_v55 }
 0x2bb   : > { %1135 = vst [vmem:[%s3486_s3 + $0x50] sm:$0xff] %v3514_v24  ;;  %v1222_v30 = vmul.f32 %v2578_v27, %v1158_v23  ;;  %v1237_v31 = vadd.f32 %v1221_v26, %v1047_v57 }
 0x2bc   : > { %v1197_v32 = vmul.f32 1.442695, %v1177_v28  ;;  %1136 = vst [vmem:[%s3486_s3 + $0x58] sm:$0xff] %v1073_v29  ;;  %v1178_v33 = vmul.f32 0.5, %v1073_v29 }
 0x2bd   : > { %v1238_v53 = vadd.f32 %v1222_v30, %v1051_v61 }
 0x2be   : > { %2583 = vpow2.f32 %v1197_v32  ;;  %v1199_v35 = vmul.f32 1.442695, %v1178_v33  ;;  %v1076_v47 = vpop.f32.mrb[12].mxu1 }
 0x2bf   : > { %v3523_v51 = vadd.f32 %v1076_v47, %v3476_v54  ;;  %v1078_v56 = vpop.f32.mrb[13].mxu1  ;;  %v1253_v58 = vpack.c.bf16 %v1238_v53, %v1237_v31  ;;  %v1163_v53 = vld [vmem:[%s3373_s9 + $0x30] sm:$0xff]  ;;  %v1164_v47 = vld [vmem:[%s3373_s9 + $0x38] sm:$0xff] }
 0x2c0   : > { %v2580_v59 = vpop.eup %2579  ;;  %2585 = vpow2.f32 %v1199_v35  ;;  %v1079_v57 = vadd.f32 %v1078_v56, %v3480_v55  ;;  %v1080_v62 = vpop.f32.mrb[14].mxu1 }
 0x2c1   : > { %v1223_v63 = vmul.f32 %v2580_v59, %v1159_v34  ;;  %1137 = vst [vmem:[%s3486_s3 + $0x60] sm:$0xff] %v3523_v51  ;;  %v3530_v61 = vadd.f32 %v1080_v62, %v3476_v54  ;;  %v1082_v0 = vpop.f32.mrb[15].mxu1  ;;  %2343 = vmatprep.mubr.bf16.mxu0 %v1253_v58 }
 0x2c2   : > { %v2582_v1 = vpop.eup %2581  ;;  %1138 = vst [vmem:[%s3486_s3 + $0x68] sm:$0xff] %v1079_v57  ;;  %v1179_v2 = vmul.f32 0.5, %v1079_v57  ;;  %v1083_v3 = vadd.f32 %v1082_v0, %v3480_v55 }
 0x2c3   : > { %v1224_v4 = vmul.f32 %v2582_v1, %v1160_v60  ;;  %1139 = vst [vmem:[%s3486_s3 + $0x70] sm:$0xff] %v3530_v61  ;;  %v1239_v6 = vadd.f32 %v1223_v63, %v3495_v5 }
 0x2c4   : > { %v1201_v7 = vmul.f32 1.442695, %v1179_v2  ;;  %1140 = vst [vmem:[%s3486_s3 + $0x78] sm:$0xff] %v1083_v3  ;;  %v1180_v8 = vmul.f32 0.5, %v1083_v3 }
 0x2c5   : > { %v1240_v10 = vadd.f32 %v1224_v4, %v1061_v9  ;;  %v1165_v4 = vld [vmem:[%s3373_s9 + $0x40] sm:$0xff] }
 0x2c6   : > { %2587 = vpow2.f32 %v1201_v7  ;;  %v1203_v11 = vmul.f32 1.442695, %v1180_v8  ;;  %v1086_v12 = vpop.f32.mrb[16].mxu1  ;;  %v1166_v8 = vld [vmem:[%s3373_s9 + $0x48] sm:$0xff] }
 0x2c7   : > { %v3540_v14 = vadd.f32 %v1086_v12, %v3476_v54  ;;  %v1088_v15 = vpop.f32.mrb[17].mxu1  ;;  %v1254_v16 = vpack.c.bf16 %v1240_v10, %v1239_v6 }
 0x2c8   : > { %v2584_v17 = vpop.eup %2583  ;;  %2589 = vpow2.f32 %v1203_v11  ;;  %v1089_v5 = vadd.f32 %v1088_v15, %v3480_v55  ;;  %v1090_v19 = vpop.f32.mrb[18].mxu1 }
 0x2c9   : > { %1141 = vst [vmem:[%s3486_s3 + $0x80] sm:$0xff] %v3540_v14  ;;  %v3547_v9 = vadd.f32 %v1090_v19, %v3476_v54  ;;  %v1092_v21 = vpop.f32.mrb[19].mxu1  ;;  %2344 = vmatmul.mubr.bf16.vlgmr.msra.gmra.mrb[32].mxu0 %v1254_v16  ;;  %v1225_v22 = vmul.f32 %v2584_v17, %v1161_v13 }
 0x2ca   : > { %v2586_v23 = vpop.eup %2585  ;;  %1142 = vst [vmem:[%s3486_s3 + $0x88] sm:$0xff] %v1089_v5  ;;  %v1181_v25 = vmul.f32 0.5, %v1089_v5  ;;  %v1093_v26 = vadd.f32 %v1092_v21, %v3480_v55  ;;  %1562 = vmatpush1.bf16.msra.mxu0 %v3433_v36 }
 0x2cb   : > { %1143 = vst [vmem:[%s3486_s3 + $0x90] sm:$0xff] %v3547_v9  ;;  %v1226_v27 = vmul.f32 %v2586_v23, %v1162_v20  ;;  %v1241_v28 = vadd.f32 %v1225_v22, %v3507_v18  ;;  %1563 = vmatprep.subr.bf16.mxu0 %v3435_v37  ;;  %v1167_v22 = vld [vmem:[%s3373_s9 + $0x50] sm:$0xff] }
 0x2cc   : > { %v1205_v29 = vmul.f32 1.442695, %v1181_v25  ;;  %1144 = vst [vmem:[%s3486_s3 + $0x98] sm:$0xff] %v1093_v26  ;;  %v1182_v30 = vmul.f32 0.5, %v1093_v26 }
 0x2cd   : > { %v1242_v31 = vadd.f32 %v1226_v27, %v3514_v24  ;;  %v1168_v27 = vld [vmem:[%s3373_s9 + $0x58] sm:$0xff] }
 0x2ce   : > { %2591 = vpow2.f32 %v1205_v29  ;;  %v1207_v32 = vmul.f32 1.442695, %v1182_v30  ;;  %v1096_v33 = vpop.f32.mrb[20].mxu1  ;;  %1564 = vmatpush1.bf16.msra.mxu0 %v3439_v38 }
 0x2cf   : > { %v3561_v36 = vadd.f32 %v1096_v33, %v3476_v54  ;;  %v1098_v18 = vpop.f32.mrb[21].mxu1  ;;  %v1255_v34 = vpack.c.bf16 %v1242_v31, %v1241_v28  ;;  %1565 = vmatprep.subr.bf16.mxu0 %v3441_v39 }
 0x2d0   : > { %v2588_v37 = vpop.eup %2587  ;;  %2593 = vpow2.f32 %v1207_v32  ;;  %v1099_v35 = vadd.f32 %v1098_v18, %v3480_v55  ;;  %v1100_v24 = vpop.f32.mrb[22].mxu1 }
 0x2d1   : > { %1145 = vst [vmem:[%s3486_s3 + $0xa0] sm:$0xff] %v3561_v36  ;;  %v3569_v38 = vadd.f32 %v1100_v24, %v3476_v54  ;;  %v1102_v56 = vpop.f32.mrb[23].mxu1  ;;  %2347 = vmatprep.mubr.bf16.mxu0 %v1255_v34  ;;  %v1227_v58 = vmul.f32 %v2588_v37, %v1163_v53  ;;  %v1169_v37 = vld [vmem:[%s3373_s9 + $0x60] sm:$0xff] }
 0x2d2   : > { %v2590_v59 = vpop.eup %2589  ;;  %1146 = vst [vmem:[%s3486_s3 + $0xa8] sm:$0xff] %v1099_v35  ;;  %v1183_v39 = vmul.f32 0.5, %v1099_v35  ;;  %v1103_v60 = vadd.f32 %v1102_v56, %v3480_v55  ;;  %1566 = vmatpush1.bf16.msra.mxu0 %v3445_v40 }
 0x2d3   : > { %1147 = vst [vmem:[%s3486_s3 + $0xb0] sm:$0xff] %v3569_v38  ;;  %v1228_v57 = vmul.f32 %v2590_v59, %v1164_v47  ;;  %v1243_v62 = vadd.f32 %v1227_v58, %v3523_v51  ;;  %1567 = vmatprep.subr.bf16.mxu0 %v3447_v41  ;;  %v1170_v47 = vld [vmem:[%s3373_s9 + $0x68] sm:$0xff] }
 0x2d4   : > { %v1209_v63 = vmul.f32 1.442695, %v1183_v39  ;;  %1148 = vst [vmem:[%s3486_s3 + $0xb8] sm:$0xff] %v1103_v60  ;;  %v1184_v0 = vmul.f32 0.5, %v1103_v60  ;;  %v1171_v39 = vld [vmem:[%s3373_s9 + $0x70] sm:$0xff] }
 0x2d5   : > { %v1244_v1 = vadd.f32 %v1228_v57, %v3530_v61 }
 0x2d6   : > { %2595 = vpow2.f32 %v1209_v63  ;;  %v1211_v2 = vmul.f32 1.442695, %v1184_v0  ;;  %v1106_v3 = vpop.f32.mrb[24].mxu1  ;;  %1568 = vmatpush1.bf16.msra.mxu0 %v3451_v42 }
 0x2d7   : > { %v3583_v40 = vadd.f32 %v1106_v3, %v3476_v54  ;;  %v1108_v51 = vpop.f32.mrb[25].mxu1  ;;  %v1256_v6 = vpack.c.bf16 %v1244_v1, %v1243_v62  ;;  %1569 = vmatprep.subr.bf16.mxu0 %v3453_v43  ;;  %v1172_v62 = vld [vmem:[%s3373_s9 + $0x78] sm:$0xff]  ;;  %s3034_s9 = smov [#allocation14]  }
 0x2d8   : > { %v2592_v41 = vpop.eup %2591  ;;  %2597 = vpow2.f32 %v1211_v2  ;;  %v1109_v7 = vadd.f32 %v1108_v51, %v3480_v55  ;;  %v1110_v61 = vpop.f32.mrb[26].mxu1  ;;  %v2569_v51 = vld [vmem:[#allocation11 + $0x60] ss:$8 sps:$4 sm:$0xff]   ;;  %s2911_s23 = sshll.u32 %s3034_s9, 4  ;;  %s2912_s23 = int_to_ptr.vmem [resolvable:$false] %s2911_s23 }
 0x2d9   : > { %1149 = vst [vmem:[%s3486_s3 + $0xc0] sm:$0xff] %v3583_v40  ;;  %v1111_v42 = vadd.f32 %v1110_v61, %v3476_v54  ;;  %v1112_v10 = vpop.f32.mrb[27].mxu1  ;;  %2348 = vmatmul.mubr.bf16.gmra.mrb[36].mxu0 %v1256_v6  ;;  %v1229_v11 = vmul.f32 %v2592_v41, %v1165_v4  ;;  %v2571_v4 = vld [vmem:[#allocation11 + $0x64] ss:$8 sps:$4 sm:$0xff]   ;;  %v2572_v6 = vld [vmem:[#allocation11 + $0x70] ss:$8 sps:$4 sm:$0xff]   ;;  %p2914_p3 = scmp.lt.s32.totalorder %s3636_s1, %s2912_s23 }
 0x2da   : > { %v2594_v12 = vpop.eup %2593  ;;  %1150 = vst [vmem:[%s3486_s3 + $0xc8] sm:$0xff] %v1109_v7  ;;  %v1185_v13 = vmul.f32 0.5, %v1109_v7  ;;  %v1113_v43 = vadd.f32 %v1112_v10, %v3480_v55  ;;  %1570 = vmatpush1.bf16.msra.mxu0 %v3457_v44  ;;  %2365 = vmatprep.subr.bf16.mxu1 %v2571_v4  ;;  %v2173_v41 = vld [vmem:[%s3806_s7] ss:$0 sm:$0xff]  ;;  %s2913_s12 = scalar_lea.vmem %s2912_s23, 8192 }
 0x2db   : > { %1151 = vst [vmem:[%s3486_s3 + $0xd0] sm:$0xff] %v1111_v42  ;;  %v1230_v15 = vmul.f32 %v2594_v12, %v1166_v8  ;;  %v1245_v16 = vadd.f32 %v1229_v11, %v3540_v14  ;;  %1571 = vmatprep.subr.bf16.mxu0 %v3459_v45  ;;  %2373 = vmatpush1.bf16.msra.mxu1 %v2569_v51  ;;  %p2915_p5 = scmp.lt.s32.totalorder %s2913_s12, %s2907_s30 }
 0x2dc   : > { %v1213_v17 = vmul.f32 1.442695, %v1185_v13  ;;  %1152 = vst [vmem:[%s3486_s3 + $0xd8] sm:$0xff] %v1113_v43  ;;  %v1186_v5 = vmul.f32 0.5, %v1113_v43 }
 0x2dd   : > { %v1246_v19 = vadd.f32 %v1230_v15, %v3547_v9  ;;  %p2916_p9 = por %p2915_p5, %p2914_p3 }
 0x2de   : > { %2599 = vpow2.f32 %v1213_v17  ;;  %v1215_v20 = vmul.f32 1.442695, %v1186_v5  ;;  %v1116_v21 = vpop.f32.mrb[28].mxu1  ;;  %1572 = vmatpush1.bf16.msra.mxu0 %v3463_v46 }
 0x2df   : > { %v1117_v44 = vadd.f32 %v1116_v21, %v3476_v54  ;;  %v1118_v23 = vpop.f32.mrb[29].mxu1  ;;  %v1257_v14 = vpack.c.bf16 %v1246_v19, %v1245_v16  ;;  %1573 = vmatprep.subr.bf16.mxu0 %v2571_v4  ;;  %p2917_p8 = pnand %p2916_p9, %p2910_p6 }
 0x2e0   : > { %v2596_v45 = vpop.eup %2595  ;;  %2601 = vpow2.f32 %v1215_v20  ;;  %v1119_v25 = vadd.f32 %v1118_v23, %v3480_v55  ;;  %v1120_v26 = vpop.f32.mrb[30].mxu1 }
 0x2e1   : > { %1153 = vst [vmem:[%s3486_s3 + $0xe0] sm:$0xff] %v1117_v44  ;;  %v1121_v9 = vadd.f32 %v1120_v26, %v3476_v54  ;;  %v1122_v28 = vpop.f32.mrb[31].mxu1  ;;  %2351 = vmatprep.mubr.bf16.mxu0 %v1257_v14  ;;  %v1231_v29 = vmul.f32 %v2596_v45, %v1167_v22 }
 0x2e2   : > { %v2598_v46 = vpop.eup %2597  ;;  %1154 = vst [vmem:[%s3486_s3 + $0xe8] sm:$0xff] %v1119_v25  ;;  %v1187_v30 = vmul.f32 0.5, %v1119_v25  ;;  %v1123_v31 = vadd.f32 %v1122_v28, %v3480_v55  ;;  %1574 = vmatpush1.bf16.msra.mxu0 %v2569_v51 }
 0x2e3   : > { %1155 = vst [vmem:[%s3486_s3 + $0xf0] sm:$0xff] %v1121_v9  ;;  %v1232_v32 = vmul.f32 %v2598_v46, %v1168_v27  ;;  %v1247_v33 = vadd.f32 %v1231_v29, %v3561_v36 }
 0x2e4   : > { %v1217_v53 = vmul.f32 1.442695, %v1187_v30  ;;  %1156 = vst [vmem:[%s3486_s3 + $0xf8] sm:$0xff] %v1123_v31  ;;  %v1188_v18 = vmul.f32 0.5, %v1123_v31 }
 0x2e5   : > { %v1248_v54 = vadd.f32 %v1232_v32, %v3569_v38 }
 0x2e6   : > { %2603 = vpow2.f32 %v1217_v53  ;;  %v1219_v34 = vmul.f32 1.442695, %v1188_v18 }
 0x2e7   : > { %v1258_v35 = vpack.c.bf16 %v1248_v54, %v1247_v33 }
 0x2e8   : > { %v2600_v24 = vpop.eup %2599  ;;  %2605 = vpow2.f32 %v1219_v34 }
 0x2e9   : > { %2352 = vmatmul.mubr.bf16.gmra.mrb[40].mxu0 %v1258_v35  ;;  %v1233_v55 = vmul.f32 %v2600_v24, %v1169_v37 }
 0x2ea   : > { %v2602_v56 = vpop.eup %2601 }
 0x2eb   : > { %v1234_v58 = vmul.f32 %v2602_v56, %v1170_v47  ;;  %v1249_v36 = vadd.f32 %v1233_v55, %v3583_v40  ;;  %v2574_v40 = vld [vmem:[#allocation11 + $0x74] ss:$8 sps:$4 sm:$0xff]  }
 0x2ec   : > { %1575 = vmatprep.subr.bf16.mxu0 %v2574_v40  ;;  %2366 = vmatprep.subr.bf16.mxu1 %v2574_v40 }
 0x2ed   : > { %v1250_v59 = vadd.f32 %v1234_v58, %v1111_v42  ;;  %1576 = vmatpush1.bf16.msra.mxu0 %v2572_v6  ;;  %2374 = vmatpush1.bf16.msra.mxu1 %v2572_v6 }
 0x2ef   : > { %v1259_v60 = vpack.c.bf16 %v1250_v59, %v1249_v36 }
 0x2f0   : > { %v2604_v57 = vpop.eup %2603 }
 0x2f1   : > { %2355 = vmatprep.mubr.bf16.mxu0 %v1259_v60  ;;  %v1235_v38 = vmul.f32 %v2604_v57, %v1171_v39 }
 0x2f2   : > { %v2606_v63 = vpop.eup %2605 }
 0x2f3   : > { %v1236_v0 = vmul.f32 %v2606_v63, %v1172_v62  ;;  %v1251_v1 = vadd.f32 %v1235_v38, %v1117_v44 }
 0x2f5   : > { %v1252_v2 = vadd.f32 %v1236_v0, %v1121_v9 }
 0x2f7   : > { %v1260_v3 = vpack.c.bf16 %v1252_v2, %v1251_v1 }
 0x2f9   : > { %2356 = vmatmul.mubr.bf16.gmra.mrb[44].mxu0 %v1260_v3 }
 0x2fa   : > { %1593 = vmatprep.mubr.bf16.mxu0 %v3033_v48 }
 0x39c   : > { %v2345_v7 = vpop.f32.mrb[32].mxu0 }
 0x39d   : > { %v1375_v61 = vadd.f32 %v2345_v7, %v2173_v41  ;;  %v1366_v8 = vpop.f32.mrb[33].mxu0 }
 0x39e   : > { %v1367_v42 = vadd.f32 %v2173_v41, %v1366_v8  ;;  %v2346_v10 = vpop.f32.mrb[34].mxu0 }
 0x39f   : > { %v1378_v11 = vadd.f32 %v2346_v10, %v2173_v41  ;;  %v1369_v12 = vpop.f32.mrb[35].mxu0  ;;  %v1431_v43 = vmax.f32 %v1375_v61, 0.0 }
 0x3a0   : > { %v1370_v13 = vadd.f32 %v2173_v41, %v1369_v12  ;;  %v1429_v16 = vmax.f32 %v1367_v42, 0.0 }
 0x3a1   : > { %v1432_v15 = vmax.f32 %v1378_v11, 0.0 }
 0x3a2   : > { %v1430_v17 = vmax.f32 %v1370_v13, 0.0 }
 0x3a3   : > { %v1446_v5 = vpack.c.bf16 %v1432_v15, %v1431_v43 }
 0x3a4   : > { %v1445_v19 = vpack.c.bf16 %v1430_v17, %v1429_v16 }
 0x3a6   : > { %1594 = vmatmul.mubr.bf16.vlgmr.msra.gmra.mrb[48].mxu0 %v1445_v19 }
 0x3a7   : > { %1603 = vmatprep.mubr.bf16.mxu0 %v3033_v48 }
 0x3ac   : > { %v2349_v20 = vpop.f32.mrb[36].mxu0 }
 0x3ad   : > { %v1391_v21 = vadd.f32 %v2349_v20, %v2173_v41  ;;  %v1382_v22 = vpop.f32.mrb[37].mxu0 }
 0x3ae   : > { %v1383_v44 = vadd.f32 %v2173_v41, %v1382_v22  ;;  %v2350_v23 = vpop.f32.mrb[38].mxu0  ;;  %1604 = vmatmul.mubr.bf16.gmra.mrb[52].mxu0 %v1446_v5 }
 0x3af   : > { %v1394_v14 = vadd.f32 %v2350_v23, %v2173_v41  ;;  %v1385_v45 = vpop.f32.mrb[39].mxu0  ;;  %v1435_v26 = vmax.f32 %v1391_v21, 0.0 }
 0x3b0   : > { %v1386_v25 = vadd.f32 %v2173_v41, %v1385_v45  ;;  %v1433_v9 = vmax.f32 %v1383_v44, 0.0 }
 0x3b1   : > { %v1436_v27 = vmax.f32 %v1394_v14, 0.0 }
 0x3b2   : > { %v1434_v28 = vmax.f32 %v1386_v25, 0.0 }
 0x3b3   : > { %v1448_v29 = vpack.c.bf16 %v1436_v27, %v1435_v26 }
 0x3b4   : > { %v1447_v46 = vpack.c.bf16 %v1434_v28, %v1433_v9 }
 0x3b6   : > { %1614 = vmatmul.mubr.bf16.vlgmr.msra.gmra.mrb[32].mxu1 %v1447_v46 }
 0x3b7   : > { %1623 = vmatprep.mubr.bf16.mxu1 %v3033_v48 }
 0x3bc   : > { %v2353_v30 = vpop.f32.mrb[40].mxu0 }
 0x3bd   : > { %v1407_v31 = vadd.f32 %v2353_v30, %v2173_v41  ;;  %v1398_v32 = vpop.f32.mrb[41].mxu0 }
 0x3be   : > { %v1399_v33 = vadd.f32 %v2173_v41, %v1398_v32  ;;  %v2354_v53 = vpop.f32.mrb[42].mxu0  ;;  %1624 = vmatmul.mubr.bf16.gmra.mrb[36].mxu1 %v1448_v29 }
 0x3bf   : > { %v1410_v18 = vadd.f32 %v2354_v53, %v2173_v41  ;;  %v1401_v54 = vpop.f32.mrb[43].mxu0  ;;  %1633 = vmatprep.mubr.bf16.mxu1 %v3033_v48  ;;  %v1439_v37 = vmax.f32 %v1407_v31, 0.0 }
 0x3c0   : > { %v1402_v34 = vadd.f32 %v2173_v41, %v1401_v54  ;;  %v1437_v24 = vmax.f32 %v1399_v33, 0.0 }
 0x3c1   : > { %v1440_v35 = vmax.f32 %v1410_v18, 0.0 }
 0x3c2   : > { %v1438_v47 = vmax.f32 %v1402_v34, 0.0 }
 0x3c3   : > { %v1450_v55 = vpack.c.bf16 %v1440_v35, %v1439_v37 }
 0x3c4   : > { %v1449_v56 = vpack.c.bf16 %v1438_v47, %v1437_v24 }
 0x3c6   : > { %1634 = vmatmul.mubr.bf16.gmra.mrb[40].mxu1 %v1449_v56 }
 0x3c7   : > { %1643 = vmatprep.mubr.bf16.mxu1 %v3033_v48 }
 0x3cc   : > { %v2357_v58 = vpop.f32.mrb[44].mxu0 }
 0x3cd   : > { %v1423_v36 = vadd.f32 %v2357_v58, %v2173_v41  ;;  %v1414_v59 = vpop.f32.mrb[45].mxu0 }
 0x3ce   : > { %v1415_v39 = vadd.f32 %v2173_v41, %v1414_v59  ;;  %v2358_v60 = vpop.f32.mrb[46].mxu0  ;;  %1644 = vmatmul.mubr.bf16.gmra.mrb[44].mxu1 %v1450_v55 }
 0x3cf   : > { %v1426_v57 = vadd.f32 %v2358_v60, %v2173_v41  ;;  %v1417_v62 = vpop.f32.mrb[47].mxu0  ;;  %1653 = vmatprep.mubr.bf16.mxu1 %v3033_v48  ;;  %v1443_v63 = vmax.f32 %v1423_v36, 0.0 }
 0x3d0   : > { %v1418_v38 = vadd.f32 %v2173_v41, %v1417_v62  ;;  %v1441_v1 = vmax.f32 %v1415_v39, 0.0 }
 0x3d1   : > { %v1444_v0 = vmax.f32 %v1426_v57, 0.0 }
 0x3d2   : > { %v1442_v2 = vmax.f32 %v1418_v38, 0.0 }
 0x3d3   : > { %v1452_v3 = vpack.c.bf16 %v1444_v0, %v1443_v63 }
 0x3d4   : > { %v1451_v4 = vpack.c.bf16 %v1442_v2, %v1441_v1 }
 0x3d6   : > { %1654 = vmatmul.mubr.bf16.gmra.mrb[48].mxu1 %v1451_v4 }
 0x3d7   : > { %1663 = vmatprep.mubr.bf16.mxu1 %v3033_v48 }
 0x3de   : > { %1664 = vmatmul.mubr.bf16.gmra.mrb[52].mxu1 %v1452_v3 }
 0x3df   : > { %2920 = shalt.err (!%p2917_p8)
}
 0x3e0   : > { %s2921_s14 = scalar_lea.hbm %s3633_s26, 4096  ;;  %s2925_s29 = scalar_lea.hbm %s3851_s11, 8192 }
 0x3e1   : > { %p2922_p11 = scmp.ne.s32.totalorder %s3633_s26, %s2921_s14  ;;  %p2926_p2 = scmp.lt.u32.totalorder %s3633_s26, %s3851_s11 }
 0x3e2   : > { %p2927_p1 = scmp.lt.u32.totalorder %s2925_s29, %s2921_s14  ;;  %p2929_p0 = scmp.lt.u32.totalorder %s2921_s14, %s3633_s26 }
 0x3e3   : > { %p2923_p7 = pnand %p2922_p11, %p3263_p10 }
 0x3e4   : > { %p2928_p13 = por %p2927_p1, %p2926_p2 }
 0x3e5   : > { %p2924_p12 = pneg %p2923_p7 }
 0x3e6   : > { %p2930_p4 = por %p2929_p0, %p2928_p13 }
 0x3e8   : > { %p2931_p6 = pnand %p2930_p4, %p2924_p12 }
 0x3ea   : > { %2934 = shalt.err (!%p2931_p6)
}
 0x3eb   : > { %s3035_s0 = smov 256   ;;  %s3036_s30 = smov 16  }
 0x3ec   : > { %2396 = dma.vmem_to_hbm [thread:$0]  (%p3263_p10), %s3636_s1, 4096, %s3633_s26, %s1904_s25, %s3035_s0, %s3035_s0, %s3036_s30  }
 0x3ed   : > { %s3852_s12 = sld [smem:[#allocation28_spill]]  ;;  %s3694_s26 = scalar_lea.vmem [#allocation13], %s2122_s10 }
 0x3ee   : > { %s1918_s10 = sshll.u32 %s3694_s26, 4  ;;  %s3853_s14 = sld [smem:[#allocation29_spill]]  ;;  %s3750_s10 = int_to_ptr.vmem [resolvable:$true] %s1918_s10 }
 0x3ef   : > { %s1899_s3 = scalar_lea.sflag [#allocation4], %s3358_s28  ;;  %s2935_s29 = scalar_lea.vmem %s3750_s10, 4096 }
 0x3f0   : > { %p2936_p3 = scmp.ne.s32.totalorder %s3750_s10, %s2935_s29  ;;  %s3037_s21 = smov [#allocation13]  }
 0x3f1   : > { %s2939_s15 = sshll.u32 %s3037_s21, 4  ;;  %s2940_s15 = int_to_ptr.vmem [resolvable:$false] %s2939_s15 }
 0x3f2   : > { %p2937_p5 = pnand %p2936_p3, %p3263_p10  ;;  %s2941_s16 = scalar_lea.vmem %s2940_s15, 8192 }
 0x3f3   : > { %v1469_v48 = vld [vmem:[%s3852_s12] sm:$0x3]  ;;  %p2942_p8 = scmp.lt.s32.totalorder %s3750_s10, %s2940_s15  ;;  %p2943_p11 = scmp.lt.s32.totalorder %s2941_s16, %s2935_s29 }
 0x3f4   : > { %v3670_v51 = vrot.slane %v1469_v48, %v924_v50  ;;  %v3674_v40 = vrot.slane %v1469_v48, %v928_v52  ;;  %s3748_s13 = scalar_lea.hbm %s3853_s14, %s2244_s27  ;;  %p2938_p9 = pneg %p2937_p5 }
 0x3f5   : > { %p2944_p7 = por %p2943_p11, %p2942_p8 }
 0x3f7   : > { %p2945_p12 = pnand %p2944_p7, %p2938_p9 }
 0x479   : > { %v1595_v6 = vpop.f32.mrb[48].mxu0 }
 0x47a   : > { %v1596_v41 = vadd.f32 %v1595_v6, %v3670_v51  ;;  %v1597_v7 = vpop.f32.mrb[49].mxu0 }
 0x47b   : > { %v1598_v61 = vadd.f32 %v1597_v7, %v3674_v40  ;;  %v1599_v8 = vpop.f32.mrb[50].mxu0 }
 0x47c   : > { %v2198_v42 = vmul.f32 -1.442695, %v1596_v41  ;;  %v1600_v10 = vadd.f32 %v1599_v8, %v3670_v51  ;;  %v1601_v11 = vpop.f32.mrb[51].mxu0 }
 0x47d   : > { %v2199_v12 = vmul.f32 -1.442695, %v1598_v61  ;;  %v1602_v13 = vadd.f32 %v1601_v11, %v3674_v40 }
 0x47e   : > { %2607 = vpow2.f32 %v2198_v42  ;;  %v2200_v50 = vmul.f32 -1.442695, %v1600_v10 }
 0x47f   : > { %2609 = vpow2.f32 %v2199_v12  ;;  %v2201_v49 = vmul.f32 -1.442695, %v1602_v13 }
 0x480   : > { %2611 = vpow2.f32 %v2200_v50 }
 0x481   : > { %2613 = vpow2.f32 %v2201_v49  ;;  %v1605_v52 = vpop.f32.mrb[52].mxu0 }
 0x482   : > { %v1606_v43 = vadd.f32 %v1605_v52, %v3670_v51  ;;  %v1607_v15 = vpop.f32.mrb[53].mxu0 }
 0x483   : > { %v1608_v16 = vadd.f32 %v1607_v15, %v3674_v40  ;;  %v1609_v17 = vpop.f32.mrb[54].mxu0 }
 0x484   : > { %v2202_v5 = vmul.f32 -1.442695, %v1606_v43  ;;  %v1610_v19 = vadd.f32 %v1609_v17, %v3670_v51  ;;  %v1611_v20 = vpop.f32.mrb[55].mxu0 }
 0x485   : > { %v2203_v21 = vmul.f32 -1.442695, %v1608_v16  ;;  %v1612_v22 = vadd.f32 %v1611_v20, %v3674_v40 }
 0x486   : > { %2615 = vpow2.f32 %v2202_v5  ;;  %v2204_v44 = vmul.f32 -1.442695, %v1610_v19 }
 0x487   : > { %2617 = vpow2.f32 %v2203_v21  ;;  %v2205_v23 = vmul.f32 -1.442695, %v1612_v22 }
 0x488   : > { %v2608_v14 = vpop.eup %2607  ;;  %2619 = vpow2.f32 %v2204_v44 }
 0x489   : > { %v2610_v45 = vpop.eup %2609  ;;  %v1770_v25 = vadd.f32 1.0, %v2608_v14  ;;  %2621 = vpow2.f32 %v2205_v23  ;;  %v1615_v26 = vpop.f32.mrb[32].mxu1 }
 0x48a   : > { %v2612_v27 = vpop.eup %2611  ;;  %v1771_v9 = vadd.f32 1.0, %v2610_v45  ;;  %v1616_v28 = vadd.f32 %v1615_v26, %v3670_v51  ;;  %v1617_v29 = vpop.f32.mrb[33].mxu1 }
 0x48b   : > { %v2614_v46 = vpop.eup %2613  ;;  %2623 = vrcp.f32 %v1770_v25  ;;  %v1772_v30 = vadd.f32 1.0, %v2612_v27  ;;  %v1618_v31 = vadd.f32 %v1617_v29, %v3674_v40  ;;  %v1619_v32 = vpop.f32.mrb[34].mxu1 }
 0x48c   : > { %2625 = vrcp.f32 %v1771_v9  ;;  %v1773_v33 = vadd.f32 1.0, %v2614_v46  ;;  %v2206_v53 = vmul.f32 -1.442695, %v1616_v28  ;;  %v1620_v18 = vadd.f32 %v1619_v32, %v3670_v51  ;;  %v1621_v54 = vpop.f32.mrb[35].mxu1 }
 0x48d   : > { %2627 = vrcp.f32 %v1772_v30  ;;  %v2207_v34 = vmul.f32 -1.442695, %v1618_v31  ;;  %v1622_v37 = vadd.f32 %v1621_v54, %v3674_v40 }
 0x48e   : > { %2629 = vrcp.f32 %v1773_v33  ;;  %v2208_v35 = vmul.f32 -1.442695, %v1620_v18 }
 0x48f   : > { %2631 = vpow2.f32 %v2206_v53  ;;  %v2209_v24 = vmul.f32 -1.442695, %v1622_v37 }
 0x490   : > { %v2616_v47 = vpop.eup %2615  ;;  %2633 = vpow2.f32 %v2207_v34 }
 0x491   : > { %v2618_v55 = vpop.eup %2617  ;;  %v1774_v56 = vadd.f32 1.0, %v2616_v47  ;;  %2635 = vpow2.f32 %v2208_v35  ;;  %v1625_v58 = vpop.f32.mrb[36].mxu1 }
 0x492   : > { %v2620_v36 = vpop.eup %2619  ;;  %v1775_v59 = vadd.f32 1.0, %v2618_v55  ;;  %2637 = vpow2.f32 %v2209_v24  ;;  %v1626_v39 = vadd.f32 %v1625_v58, %v3670_v51  ;;  %v1627_v60 = vpop.f32.mrb[37].mxu1 }
 0x493   : > { %v2622_v57 = vpop.eup %2621  ;;  %2639 = vrcp.f32 %v1774_v56  ;;  %v1776_v62 = vadd.f32 1.0, %v2620_v36  ;;  %v1628_v38 = vadd.f32 %v1627_v60, %v3674_v40  ;;  %v1629_v63 = vpop.f32.mrb[38].mxu1 }
 0x494   : > { %2641 = vrcp.f32 %v1775_v59  ;;  %v1777_v0 = vadd.f32 1.0, %v2622_v57  ;;  %v2210_v1 = vmul.f32 -1.442695, %v1626_v39  ;;  %v1630_v2 = vadd.f32 %v1629_v63, %v3670_v51  ;;  %v1631_v3 = vpop.f32.mrb[39].mxu1 }
 0x495   : > { %v2624_v4 = vpop.eup %2623  ;;  %2643 = vrcp.f32 %v1776_v62  ;;  %v2211_v48 = vmul.f32 -1.442695, %v1628_v38  ;;  %v1632_v6 = vadd.f32 %v1631_v3, %v3674_v40 }
 0x496   : > { %v2626_v41 = vpop.eup %2625  ;;  %1866 = vst [vmem:[%s3694_s26] sm:$0xff] %v2624_v4  ;;  %2645 = vrcp.f32 %v1777_v0  ;;  %v2212_v7 = vmul.f32 -1.442695, %v1630_v2 }
 0x497   : > { %v2628_v61 = vpop.eup %2627  ;;  %1867 = vst [vmem:[%s3694_s26 + $0x8] sm:$0xff] %v2626_v41  ;;  %2647 = vpow2.f32 %v2210_v1  ;;  %v2213_v8 = vmul.f32 -1.442695, %v1632_v6 }
 0x498   : > { %v2630_v42 = vpop.eup %2629  ;;  %1868 = vst [vmem:[%s3694_s26 + $0x10] sm:$0xff] %v2628_v61  ;;  %2649 = vpow2.f32 %v2211_v48 }
 0x499   : > { %v2632_v10 = vpop.eup %2631  ;;  %1869 = vst [vmem:[%s3694_s26 + $0x18] sm:$0xff] %v2630_v42  ;;  %2651 = vpow2.f32 %v2212_v7  ;;  %v1635_v11 = vpop.f32.mrb[40].mxu1 }
 0x49a   : > { %v2634_v12 = vpop.eup %2633  ;;  %v1778_v13 = vadd.f32 1.0, %v2632_v10  ;;  %2653 = vpow2.f32 %v2213_v8  ;;  %v1636_v50 = vadd.f32 %v1635_v11, %v3670_v51  ;;  %v1637_v49 = vpop.f32.mrb[41].mxu1 }
 0x49b   : > { %v2636_v52 = vpop.eup %2635  ;;  %v1779_v43 = vadd.f32 1.0, %v2634_v12  ;;  %v1638_v15 = vadd.f32 %v1637_v49, %v3674_v40  ;;  %v1639_v16 = vpop.f32.mrb[42].mxu1 }
 0x49c   : > { %v2638_v17 = vpop.eup %2637  ;;  %2655 = vrcp.f32 %v1778_v13  ;;  %v1780_v5 = vadd.f32 1.0, %v2636_v52  ;;  %v2214_v19 = vmul.f32 -1.442695, %v1636_v50  ;;  %v1640_v20 = vadd.f32 %v1639_v16, %v3670_v51  ;;  %v1641_v21 = vpop.f32.mrb[43].mxu1 }
 0x49d   : > { %v2640_v22 = vpop.eup %2639  ;;  %2657 = vrcp.f32 %v1779_v43  ;;  %v1781_v44 = vadd.f32 1.0, %v2638_v17  ;;  %v2215_v23 = vmul.f32 -1.442695, %v1638_v15  ;;  %v1642_v14 = vadd.f32 %v1641_v21, %v3674_v40 }
 0x49e   : > { %v2642_v45 = vpop.eup %2641  ;;  %1870 = vst [vmem:[%s3694_s26 + $0x20] sm:$0xff] %v2640_v22  ;;  %2659 = vrcp.f32 %v1780_v5  ;;  %v2216_v25 = vmul.f32 -1.442695, %v1640_v20 }
 0x49f   : > { %v2644_v26 = vpop.eup %2643  ;;  %1871 = vst [vmem:[%s3694_s26 + $0x28] sm:$0xff] %v2642_v45  ;;  %2661 = vrcp.f32 %v1781_v44  ;;  %v2217_v27 = vmul.f32 -1.442695, %v1642_v14 }
 0x4a0   : > { %v2646_v9 = vpop.eup %2645  ;;  %1872 = vst [vmem:[%s3694_s26 + $0x30] sm:$0xff] %v2644_v26  ;;  %2663 = vpow2.f32 %v2214_v19 }
 0x4a1   : > { %v2648_v28 = vpop.eup %2647  ;;  %1873 = vst [vmem:[%s3694_s26 + $0x38] sm:$0xff] %v2646_v9  ;;  %2665 = vpow2.f32 %v2215_v23  ;;  %v1645_v29 = vpop.f32.mrb[44].mxu1 }
 0x4a2   : > { %v2650_v46 = vpop.eup %2649  ;;  %v1782_v30 = vadd.f32 1.0, %v2648_v28  ;;  %2667 = vpow2.f32 %v2216_v25  ;;  %v1646_v31 = vadd.f32 %v1645_v29, %v3670_v51  ;;  %v1647_v32 = vpop.f32.mrb[45].mxu1 }
 0x4a3   : > { %v2652_v33 = vpop.eup %2651  ;;  %v1783_v53 = vadd.f32 1.0, %v2650_v46  ;;  %2669 = vpow2.f32 %v2217_v27  ;;  %v1648_v18 = vadd.f32 %v1647_v32, %v3674_v40  ;;  %v1649_v54 = vpop.f32.mrb[46].mxu1 }
 0x4a4   : > { %v2654_v34 = vpop.eup %2653  ;;  %2671 = vrcp.f32 %v1782_v30  ;;  %v1784_v37 = vadd.f32 1.0, %v2652_v33  ;;  %v2218_v35 = vmul.f32 -1.442695, %v1646_v31  ;;  %v1650_v24 = vadd.f32 %v1649_v54, %v3670_v51  ;;  %v1651_v47 = vpop.f32.mrb[47].mxu1 }
 0x4a5   : > { %2673 = vrcp.f32 %v1783_v53  ;;  %v1785_v55 = vadd.f32 1.0, %v2654_v34  ;;  %v2219_v56 = vmul.f32 -1.442695, %v1648_v18  ;;  %v1652_v58 = vadd.f32 %v1651_v47, %v3674_v40 }
 0x4a6   : > { %v2656_v36 = vpop.eup %2655  ;;  %2675 = vrcp.f32 %v1784_v37  ;;  %v2220_v59 = vmul.f32 -1.442695, %v1650_v24 }
 0x4a7   : > { %v2658_v39 = vpop.eup %2657  ;;  %1874 = vst [vmem:[%s3694_s26 + $0x40] sm:$0xff] %v2656_v36  ;;  %2677 = vrcp.f32 %v1785_v55  ;;  %v2221_v60 = vmul.f32 -1.442695, %v1652_v58 }
 0x4a8   : > { %v2660_v57 = vpop.eup %2659  ;;  %1875 = vst [vmem:[%s3694_s26 + $0x48] sm:$0xff] %v2658_v39  ;;  %2679 = vpow2.f32 %v2218_v35 }
 0x4a9   : > { %v2662_v62 = vpop.eup %2661  ;;  %1876 = vst [vmem:[%s3694_s26 + $0x50] sm:$0xff] %v2660_v57  ;;  %2681 = vpow2.f32 %v2219_v56  ;;  %v1655_v38 = vpop.f32.mrb[48].mxu1 }
 0x4aa   : > { %v2664_v63 = vpop.eup %2663  ;;  %1877 = vst [vmem:[%s3694_s26 + $0x58] sm:$0xff] %v2662_v62  ;;  %2683 = vpow2.f32 %v2220_v59  ;;  %v1656_v0 = vadd.f32 %v1655_v38, %v3670_v51  ;;  %v1657_v1 = vpop.f32.mrb[49].mxu1 }
 0x4ab   : > { %v2666_v2 = vpop.eup %2665  ;;  %v1786_v3 = vadd.f32 1.0, %v2664_v63  ;;  %2685 = vpow2.f32 %v2221_v60  ;;  %v1658_v4 = vadd.f32 %v1657_v1, %v3674_v40  ;;  %v1659_v48 = vpop.f32.mrb[50].mxu1 }
 0x4ac   : > { %v2668_v6 = vpop.eup %2667  ;;  %v1787_v41 = vadd.f32 1.0, %v2666_v2  ;;  %v1660_v7 = vadd.f32 %v1659_v48, %v3670_v51  ;;  %v1661_v61 = vpop.f32.mrb[51].mxu1  ;;  %v2222_v10 = vmul.f32 -1.442695, %v1656_v0 }
 0x4ad   : > { %v2670_v8 = vpop.eup %2669  ;;  %2687 = vrcp.f32 %v1786_v3  ;;  %v1788_v42 = vadd.f32 1.0, %v2668_v6  ;;  %v1662_v11 = vadd.f32 %v1661_v61, %v3674_v40  ;;  %v2223_v50 = vmul.f32 -1.442695, %v1658_v4 }
 0x4ae   : > { %v2672_v12 = vpop.eup %2671  ;;  %2689 = vrcp.f32 %v1787_v41  ;;  %v1789_v13 = vadd.f32 1.0, %v2670_v8  ;;  %v2224_v52 = vmul.f32 -1.442695, %v1660_v7 }
 0x4af   : > { %v2674_v49 = vpop.eup %2673  ;;  %1878 = vst [vmem:[%s3694_s26 + $0x60] sm:$0xff] %v2672_v12  ;;  %2691 = vrcp.f32 %v1788_v42  ;;  %v2225_v15 = vmul.f32 -1.442695, %v1662_v11 }
 0x4b0   : > { %v2676_v43 = vpop.eup %2675  ;;  %1879 = vst [vmem:[%s3694_s26 + $0x68] sm:$0xff] %v2674_v49  ;;  %2693 = vrcp.f32 %v1789_v13 }
 0x4b1   : > { %v2678_v16 = vpop.eup %2677  ;;  %1880 = vst [vmem:[%s3694_s26 + $0x70] sm:$0xff] %v2676_v43  ;;  %2695 = vpow2.f32 %v2222_v10  ;;  %v1665_v17 = vpop.f32.mrb[52].mxu1 }
 0x4b2   : > { %v2680_v5 = vpop.eup %2679  ;;  %1881 = vst [vmem:[%s3694_s26 + $0x78] sm:$0xff] %v2678_v16  ;;  %2697 = vpow2.f32 %v2223_v50  ;;  %v1666_v19 = vadd.f32 %v1665_v17, %v3670_v51  ;;  %v1667_v20 = vpop.f32.mrb[53].mxu1 }
 0x4b3   : > { %v2682_v21 = vpop.eup %2681  ;;  %v1790_v22 = vadd.f32 1.0, %v2680_v5  ;;  %2699 = vpow2.f32 %v2224_v52  ;;  %v1668_v44 = vadd.f32 %v1667_v20, %v3674_v40  ;;  %v1669_v23 = vpop.f32.mrb[54].mxu1 }
 0x4b4   : > { %v2684_v14 = vpop.eup %2683  ;;  %v1791_v45 = vadd.f32 1.0, %v2682_v21  ;;  %2701 = vpow2.f32 %v2225_v15  ;;  %v1670_v25 = vadd.f32 %v1669_v23, %v3670_v51  ;;  %v1671_v26 = vpop.f32.mrb[55].mxu1  ;;  %v2226_v28 = vmul.f32 -1.442695, %v1666_v19 }
 0x4b5   : > { %v2686_v27 = vpop.eup %2685  ;;  %2703 = vrcp.f32 %v1790_v22  ;;  %v1792_v9 = vadd.f32 1.0, %v2684_v14  ;;  %v1672_v29 = vadd.f32 %v1671_v26, %v3674_v40  ;;  %v2227_v30 = vmul.f32 -1.442695, %v1668_v44 }
 0x4b6   : > { %2705 = vrcp.f32 %v1791_v45  ;;  %v1793_v46 = vadd.f32 1.0, %v2686_v27  ;;  %v2228_v32 = vmul.f32 -1.442695, %v1670_v25 }
 0x4b7   : > { %v2688_v31 = vpop.eup %2687  ;;  %2707 = vrcp.f32 %v1792_v9  ;;  %v2229_v51 = vmul.f32 -1.442695, %v1672_v29 }
 0x4b8   : > { %v2690_v33 = vpop.eup %2689  ;;  %1882 = vst [vmem:[%s3694_s26 + $0x80] sm:$0xff] %v2688_v31  ;;  %2709 = vrcp.f32 %v1793_v46 }
 0x4b9   : > { %v2692_v53 = vpop.eup %2691  ;;  %1883 = vst [vmem:[%s3694_s26 + $0x88] sm:$0xff] %v2690_v33  ;;  %2711 = vpow2.f32 %v2226_v28 }
 0x4ba   : > { %v2694_v18 = vpop.eup %2693  ;;  %1884 = vst [vmem:[%s3694_s26 + $0x90] sm:$0xff] %v2692_v53  ;;  %2713 = vpow2.f32 %v2227_v30 }
 0x4bb   : > { %v2696_v54 = vpop.eup %2695  ;;  %1885 = vst [vmem:[%s3694_s26 + $0x98] sm:$0xff] %v2694_v18  ;;  %2715 = vpow2.f32 %v2228_v32 }
 0x4bc   : > { %v2698_v40 = vpop.eup %2697  ;;  %v1794_v34 = vadd.f32 1.0, %v2696_v54  ;;  %2717 = vpow2.f32 %v2229_v51 }
 0x4bd   : > { %v2700_v37 = vpop.eup %2699  ;;  %v1795_v35 = vadd.f32 1.0, %v2698_v40 }
 0x4be   : > { %v2702_v24 = vpop.eup %2701  ;;  %2719 = vrcp.f32 %v1794_v34  ;;  %v1796_v47 = vadd.f32 1.0, %v2700_v37 }
 0x4bf   : > { %v2704_v55 = vpop.eup %2703  ;;  %2721 = vrcp.f32 %v1795_v35  ;;  %v1797_v56 = vadd.f32 1.0, %v2702_v24 }
 0x4c0   : > { %v2706_v58 = vpop.eup %2705  ;;  %1886 = vst [vmem:[%s3694_s26 + $0xa0] sm:$0xff] %v2704_v55  ;;  %2723 = vrcp.f32 %v1796_v47 }
 0x4c1   : > { %v2708_v36 = vpop.eup %2707  ;;  %1887 = vst [vmem:[%s3694_s26 + $0xa8] sm:$0xff] %v2706_v58  ;;  %2725 = vrcp.f32 %v1797_v56 }
 0x4c2   : > { %v2710_v59 = vpop.eup %2709  ;;  %1888 = vst [vmem:[%s3694_s26 + $0xb0] sm:$0xff] %v2708_v36 }
 0x4c3   : > { %v2712_v39 = vpop.eup %2711  ;;  %1889 = vst [vmem:[%s3694_s26 + $0xb8] sm:$0xff] %v2710_v59 }
 0x4c4   : > { %v2714_v60 = vpop.eup %2713  ;;  %v1798_v57 = vadd.f32 1.0, %v2712_v39 }
 0x4c5   : > { %v2716_v62 = vpop.eup %2715  ;;  %v1799_v38 = vadd.f32 1.0, %v2714_v60 }
 0x4c6   : > { %v2718_v63 = vpop.eup %2717  ;;  %2727 = vrcp.f32 %v1798_v57  ;;  %v1800_v0 = vadd.f32 1.0, %v2716_v62 }
 0x4c7   : > { %2729 = vrcp.f32 %v1799_v38  ;;  %v1801_v1 = vadd.f32 1.0, %v2718_v63 }
 0x4c8   : > { %v2720_v2 = vpop.eup %2719  ;;  %2731 = vrcp.f32 %v1800_v0 }
 0x4c9   : > { %v2722_v3 = vpop.eup %2721  ;;  %1890 = vst [vmem:[%s3694_s26 + $0xc0] sm:$0xff] %v2720_v2  ;;  %2733 = vrcp.f32 %v1801_v1 }
 0x4ca   : > { %v2724_v4 = vpop.eup %2723  ;;  %1891 = vst [vmem:[%s3694_s26 + $0xc8] sm:$0xff] %v2722_v3 }
 0x4cb   : > { %v2726_v48 = vpop.eup %2725  ;;  %1892 = vst [vmem:[%s3694_s26 + $0xd0] sm:$0xff] %v2724_v4 }
 0x4cc   : > { %1893 = vst [vmem:[%s3694_s26 + $0xd8] sm:$0xff] %v2726_v48 }
 0x4d0   : > { %v2728_v6 = vpop.eup %2727 }
 0x4d1   : > { %v2730_v41 = vpop.eup %2729  ;;  %1894 = vst [vmem:[%s3694_s26 + $0xe0] sm:$0xff] %v2728_v6 }
 0x4d2   : > { %v2732_v7 = vpop.eup %2731  ;;  %1895 = vst [vmem:[%s3694_s26 + $0xe8] sm:$0xff] %v2730_v41 }
 0x4d3   : > { %v2734_v61 = vpop.eup %2733  ;;  %1896 = vst [vmem:[%s3694_s26 + $0xf0] sm:$0xff] %v2732_v7 }
 0x4d4   : > { %1897 = vst [vmem:[%s3694_s26 + $0xf8] sm:$0xff] %v2734_v61 }
 0x4d5   : > { %2948 = shalt.err (!%p2945_p12)
}
 0x4d6   : > { %s2949_s27 = scalar_lea.hbm %s3748_s13, 4096  ;;  %s2953_s12 = scalar_lea.hbm %s3853_s14, 8192 }
 0x4d7   : > { %p2950_p2 = scmp.ne.s32.totalorder %s3748_s13, %s2949_s27  ;;  %p2954_p0 = scmp.lt.u32.totalorder %s3748_s13, %s3853_s14 }
 0x4d8   : > { %p2955_p4 = scmp.lt.u32.totalorder %s2953_s12, %s2949_s27  ;;  %p2957_p3 = scmp.lt.u32.totalorder %s2949_s27, %s3748_s13 }
 0x4d9   : > { %p2951_p1 = pnand %p2950_p2, %p3263_p10 }
 0x4da   : > { %p2956_p6 = por %p2955_p4, %p2954_p0 }
 0x4db   : > { %p2952_p13 = pneg %p2951_p1 }
 0x4dc   : > { %p2958_p5 = por %p2957_p3, %p2956_p6 }
 0x4de   : > { %p2959_p9 = pnand %p2958_p5, %p2952_p13 }
 0x4e0   : > { %2962 = shalt.err (!%p2959_p9)
}
 0x4e1   : > { %2395 = dma.vmem_to_hbm [thread:$0]  (%p3263_p10), %s3750_s10, 4096, %s3748_s13, %s1899_s3, %s3035_s0, %s3035_s0, %s3036_s30  }
 0x4e2 PF: > { %s3854_s25 = sld [smem:[#allocation23_spill]]  ;;  %s3855_s29 = sld [smem:[#allocation24_spill]] }
 0x4e3   : > { %p3857_p11 = scmp.ge.s32.totalorder %s3021_s20, 2 }
 0x4e8   : > { %s1950_s21 = sand.u32 1, %s3854_s25   ;;  %p3856_p8 = scmp.ne.s32.totalorder %s3855_s29, 0 }
 0x4e9   : > { %s1951_s15 = scalar_lea.sflag [#allocation4], %s1950_s21 }
 0x4ea   : > { %p2420_p7 = pnand %p3857_p11, %p3856_p8 }
 0x4ec   : > { %3000 = dma.done.wait (!%p2420_p7), %s1951_s15, 4096  }
 0x4ed   : > { %3002 = vsyncadd (!%p2420_p7), %s1951_s15, 4294963200  ;;  %s1960_s17 = scalar_lea.sflag [#allocation15], %s1950_s21 }
 0x4ee   : > { %3004 = dma.done.wait (!%p2420_p7), %s1960_s17, 4096  }
 0x4ef   : > { %3006 = vsyncadd (!%p2420_p7), %s1960_s17, 4294963200  ;;  %p33_p10 = scmp.ge.s32.totalorder %s3253_s24, 4   ;;  %s3858_s17 = smov %s3013_s18 }
 0x4f0   : > { %s3859_s18 = smov %s3017_s19  ;;  %s3860_s19 = smov %s3269_s22 }
 0x4f1   : > { %s3861_s20 = smov %s3253_s24  ;;  %35 = sbr.rel (!%p33_p10) target bundleno = 18 (0x12), region = 151 }
 0x4f8   :  { %1965 = vsyncpa [#allocation3], 1 }
 0x4f9   :  { %1967 = vsyncpa [#allocation3 + $0x1], 1 }
 0x4fa   :  { %1968 = vsyncpa [#allocation6], 1 }
 0x4fb   :  { %1969 = vsyncpa [#allocation9], 1 }
 0x4fc   :  { %1971 = vsyncpa [#allocation9 + $0x1], 1 }
 0x4fd   :  { %1972 = vsyncpa [#allocation12], 1 }
 0x4fe   :  { %1973 = vsyncpa [#allocation4], 1 }
 0x4ff   :  { %1975 = vsyncpa [#allocation4 + $0x1], 1 }
 0x500   :  { %1976 = vsyncpa [#allocation15], 1 }
 0x501   :  { %1978 = vsyncpa [#allocation15 + $0x1], 1 }

</bundles_post_ra>
